<compile_context>
chip_gen: v6e
topology: v6e:2x2x1
jax: 0.10.0
libtpu: 0.0.40
codegen_flags: <defaults>
</compile_context>

<pallas_src>
import functools

import jax
import jax.numpy as jnp
from jax.experimental import pallas as pl
from jax.experimental.pallas import tpu as pltpu

LANE = 128
SUBLANE = 8


def _round_up(x, m):
    return (x + m - 1) // m * m


def _pick_chunk(s, cap=32):
    """Largest divisor of s that is <= cap (time-chunk length)."""
    t = min(s, cap)
    while s % t:
        t -= 1
    return t


def _pick_tile(dim, cap, mult):
    """Largest multiple of `mult` <= cap that divides dim (dim is a multiple of mult)."""
    cap = min(dim, cap)
    cap -= cap % mult
    for t in range(cap, 0, -mult):
        if dim % t == 0:
            return t
    return dim


# ----------------------------------------------------------------------------
# GRU layer kernel. Grid iterates over time-chunks; hidden state lives in VMEM
# scratch across chunks. PyTorch gate math (order r, z, n):
#   r = sigmoid(x W_ir + b_ir + h W_hr + b_hr)
#   z = sigmoid(x W_iz + b_iz + h W_hz + b_hz)
#   n = tanh  (x W_in + b_in + r * (h W_hn + b_hn))
#   h' = (1 - z) * n + z * h
# ----------------------------------------------------------------------------
def gru_layer_kernel(x_ref, wih_ref, whh_ref, bih_ref, bhh_ref, out_ref, h_scratch):
    # x_ref:   (T, B, E)  f32    wih_ref: (E, 3H) bf16   whh_ref: (H, 3H) bf16
    # b*_ref:  (1, 3H)    f32    out_ref: (T, B, H) f32  h_scratch: (B, H) f32
    T, B, E = x_ref.shape
    H = h_scratch.shape[-1]

    @pl.when(pl.program_id(0) == 0)
    def _():
        h_scratch[...] = jnp.zeros_like(h_scratch)

    # Hoisted input-gate matmul for the whole chunk: one big MXU pass.
    x2 = x_ref[...].reshape(T * B, E).astype(jnp.bfloat16)
    gi_all = (jnp.dot(x2, wih_ref[...], preferred_element_type=jnp.float32)
              + bih_ref[...])                                   # (T*B, 3H) f32

    whh = whh_ref[...]
    bhh = bhh_ref[...]
    h = h_scratch[...]

    # Serial recurrence: only (B,H) x (H,3H) stays inside the time loop.
    for t in range(T):  # static unroll; T <= 32
        gi = gi_all[t * B:(t + 1) * B]                          # (B, 3H), aligned slice
        gh = (jnp.dot(h.astype(jnp.bfloat16), whh,
                      preferred_element_type=jnp.float32) + bhh)  # (B, 3H)
        r = jax.nn.sigmoid(gi[:, 0:H] + gh[:, 0:H])
        z = jax.nn.sigmoid(gi[:, H:2 * H] + gh[:, H:2 * H])
        n = jnp.tanh(gi[:, 2 * H:3 * H] + r * gh[:, 2 * H:3 * H])
        h = (1.0 - z) * n + z * h
        out_ref[t] = h                                          # VMEM-resident output block

    h_scratch[...] = h


def gru_layer(x, wih, whh, bih, bhh, *, t_chunk):
    """x: (S, B, E) f32; wih: (E, 3H) bf16; whh: (H, 3H) bf16; biases: (1, 3H) f32."""
    S, B, E = x.shape
    H = whh.shape[0]
    return pl.pallas_call(
        gru_layer_kernel,
        out_shape=jax.ShapeDtypeStruct((S, B, H), jnp.float32),
        grid_spec=pltpu.PrefetchScalarGridSpec(
            num_scalar_prefetch=0,
            grid=(S // t_chunk,),
            in_specs=[
                pl.BlockSpec((t_chunk, B, E), lambda c: (c, 0, 0)),
                pl.BlockSpec((E, 3 * H), lambda c: (0, 0)),
                pl.BlockSpec((H, 3 * H), lambda c: (0, 0)),
                pl.BlockSpec((1, 3 * H), lambda c: (0, 0)),
                pl.BlockSpec((1, 3 * H), lambda c: (0, 0)),
            ],
            out_specs=pl.BlockSpec((t_chunk, B, H), lambda c: (c, 0, 0)),
            scratch_shapes=[pltpu.VMEM((B, H), jnp.float32)],
        ),
        compiler_params=pltpu.CompilerParams(
            # Sequential over chunks: hidden state carried in scratch. Never "parallel".
            dimension_semantics=("arbitrary",)),
    )(x, wih, whh, bih, bhh)


# ----------------------------------------------------------------------------
# Final Linear projection kernel, tiled over rows and vocab (both parallel).
# ----------------------------------------------------------------------------
def fc_kernel(x_ref, w_ref, b_ref, out_ref):
    out_ref[...] = (
        jnp.dot(x_ref[...].astype(jnp.bfloat16), w_ref[...],
                preferred_element_type=jnp.float32)
        + b_ref[...]
    )


def linear(x2d, w, b):
    """x2d: (N, H) f32; w: (H, V) bf16; b: (1, V) f32 -> (N, V) f32."""
    N, H = x2d.shape
    V = w.shape[1]
    tn = _pick_tile(N, 256, SUBLANE)
    tv = _pick_tile(V, 512, LANE)
    return pl.pallas_call(
        fc_kernel,
        out_shape=jax.ShapeDtypeStruct((N, V), jnp.float32),
        grid_spec=pltpu.PrefetchScalarGridSpec(
            num_scalar_prefetch=0,
            grid=(N // tn, V // tv),
            in_specs=[
                pl.BlockSpec((tn, H), lambda i, j: (i, 0)),
                pl.BlockSpec((H, tv), lambda i, j: (0, j)),
                pl.BlockSpec((1, tv), lambda i, j: (0, j)),
            ],
            out_specs=pl.BlockSpec((tn, tv), lambda i, j: (i, j)),
        ),
        compiler_params=pltpu.CompilerParams(
            dimension_semantics=("parallel", "parallel")),
    )(x2d, w, b)


# ----------------------------------------------------------------------------
# Parameters: logical (PyTorch-layout) params + padded/bf16 kernel params.
# ----------------------------------------------------------------------------
def init_params(key, vocab_size, embed_size, hidden_size, num_layers):
    params = {}
    k_emb, key = jax.random.split(key)
    params["embedding"] = jax.random.normal(
        k_emb, (vocab_size, embed_size), jnp.float32)

    scale = 1.0 / jnp.sqrt(hidden_size)
    layers = []
    in_size = embed_size
    for _ in range(num_layers):
        key, k1, k2, k3, k4 = jax.random.split(key, 5)
        layers.append({
            # stored transposed for row-major matmul: (in, 3H), (H, 3H)
            "wih": jax.random.uniform(k1, (in_size, 3 * hidden_size),
                                      jnp.float32, -scale, scale),
            "whh": jax.random.uniform(k2, (hidden_size, 3 * hidden_size),
                                      jnp.float32, -scale, scale),
            "bih": jax.random.uniform(k3, (1, 3 * hidden_size),
                                      jnp.float32, -scale, scale),
            "bhh": jax.random.uniform(k4, (1, 3 * hidden_size),
                                      jnp.float32, -scale, scale),
        })
        in_size = hidden_size
    params["gru"] = layers

    key, k5, k6 = jax.random.split(key, 3)
    params["fc_w"] = jax.random.uniform(
        k5, (hidden_size, vocab_size), jnp.float32, -scale, scale)
    params["fc_b"] = jax.random.uniform(
        k6, (1, vocab_size), jnp.float32, -scale, scale)
    return params


def prepare_params(params):
    """Pad lane dims to 128 (per-gate for GRU weights) and cast MXU operands to bf16."""
    emb = params["embedding"]
    _, E = emb.shape
    H = params["gru"][0]["whh"].shape[0]
    V = params["fc_w"].shape[1]
    E_pad = _round_up(E, LANE)
    H_pad = _round_up(H, LANE)
    V_pad = _round_up(V, LANE)

    def pad_gates_w(w, in_pad, h, h_pad):
        i = w.shape[0]
        w3 = w.reshape(i, 3, h)
        w3 = jnp.pad(w3, ((0, in_pad - i), (0, 0), (0, h_pad - h)))
        return w3.reshape(in_pad, 3 * h_pad)

    def pad_gates_b(b, h, h_pad):
        b3 = b.reshape(1, 3, h)
        b3 = jnp.pad(b3, ((0, 0), (0, 0), (0, h_pad - h)))
        return b3.reshape(1, 3 * h_pad)

    prep = {
        "embedding": jnp.pad(emb, ((0, 0), (0, E_pad - E))),
        "gru": [],
        "fc_w": jnp.pad(params["fc_w"],
                        ((0, H_pad - H), (0, V_pad - V))).astype(jnp.bfloat16),
        "fc_b": jnp.pad(params["fc_b"], ((0, 0), (0, V_pad - V))),
    }
    in_pad = E_pad
    for layer in params["gru"]:
        prep["gru"].append({
            "wih": pad_gates_w(layer["wih"], in_pad, H, H_pad).astype(jnp.bfloat16),
            "whh": pad_gates_w(layer["whh"], H_pad, H, H_pad).astype(jnp.bfloat16),
            "bih": pad_gates_b(layer["bih"], H, H_pad),
            "bhh": pad_gates_b(layer["bhh"], H, H_pad),
        })
        in_pad = H_pad
    return prep


# ----------------------------------------------------------------------------
# Full model forward (on padded/bf16 params).
# ----------------------------------------------------------------------------
@functools.partial(jax.jit, static_argnames=("vocab_size",))
def llama_simple_forward(prep_params, x_tokens, *, vocab_size):
    """x_tokens: (S, B) int32 -> logits (S, B, V)."""
    S, B = x_tokens.shape
    B_pad = _round_up(B, SUBLANE)
    tok = jnp.pad(x_tokens, ((0, 0), (0, B_pad - B)))

    # Embedding gather: plain JAX glue (data-dependent row gather, not a tiled hot path).
    h = jnp.take(prep_params["embedding"], tok, axis=0)        # (S, B_pad, E_pad) f32

    t_chunk = _pick_chunk(S)
    for layer in prep_params["gru"]:
        h = gru_layer(h, layer["wih"], layer["whh"], layer["bih"], layer["bhh"],
                      t_chunk=t_chunk)

    H_pad = h.shape[-1]
    logits = linear(h.reshape(S * B_pad, H_pad),
                    prep_params["fc_w"], prep_params["fc_b"])   # (S*B_pad, V_pad)
    V_pad = logits.shape[-1]
    return logits.reshape(S, B_pad, V_pad)[:, :B, :vocab_size]


# ----------------------------------------------------------------------------
# Pure-JAX f32 reference (unpadded params), for a sanity check.
# ----------------------------------------------------------------------------
def reference_forward(params, x_tokens):
    emb = jnp.take(params["embedding"], x_tokens, axis=0)
    h = emb
    for layer in params["gru"]:
        S, B, _ = h.shape
        Hs = layer["whh"].shape[0]

        def step(h_prev, x_t, layer=layer, Hs=Hs):
            gi = x_t @ layer["wih"] + layer["bih"]
            gh = h_prev @ layer["whh"] + layer["bhh"]
            r = jax.nn.sigmoid(gi[:, :Hs] + gh[:, :Hs])
            z = jax.nn.sigmoid(gi[:, Hs:2 * Hs] + gh[:, Hs:2 * Hs])
            n = jnp.tanh(gi[:, 2 * Hs:] + r * gh[:, 2 * Hs:])
            h_new = (1.0 - z) * n + z * h_prev
            return h_new, h_new

        _, outs = jax.lax.scan(step, jnp.zeros((B, Hs), jnp.float32), h)
        h = outs
    S, B, Hs = h.shape
    logits = h.reshape(S * B, Hs) @ params["fc_w"] + params["fc_b"]
    return logits.reshape(S, B, -1)


if __name__ == "__main__":
    vocab_size = 64
    embed_size = 32
    hidden_size = 32
    num_layers = 2
    seq_len = 8
    batch = 2

    key = jax.random.PRNGKey(0)
    k_params, k_tokens = jax.random.split(key)
    params = init_params(k_params, vocab_size, embed_size, hidden_size, num_layers)
    prep = prepare_params(params)

    x_tokens = jax.random.randint(k_tokens, (seq_len, batch), 0, vocab_size,
                                  dtype=jnp.int32)

    logits = llama_simple_forward(prep, x_tokens, vocab_size=vocab_size)
    logits = jax.block_until_ready(logits)

    ref = jax.block_until_ready(reference_forward(params, x_tokens))
    assert logits.shape == (seq_len, batch, vocab_size)
    max_err = float(jnp.max(jnp.abs(logits - ref)))
    # bf16 MXU operands (f32 accumulation / f32 hidden carry) vs f32 reference.
    assert jnp.allclose(logits, ref, atol=2e-2, rtol=2e-2), max_err

    print("KERNEL_OK")
</pallas_src>

<mosaic_0001>
module attributes {stable_mosaic.version = 11 : i64} {
  func.func @fc_kernel(%arg0: i32, %arg1: i32, %arg2: memref<64x128xf32, #tpu.memory_space<vmem>>, %arg3: memref<128x128xbf16, #tpu.memory_space<vmem>>, %arg4: memref<1x128xf32, #tpu.memory_space<vmem>>, %arg5: memref<64x128xf32, #tpu.memory_space<vmem>>) attributes {dimension_semantics = [#tpu.dimension_semantics<parallel>, #tpu.dimension_semantics<parallel>], iteration_bounds = array<i64: 1, 1>, scalar_prefetch = 0 : i64, scratch_operands = 0 : i64, tpu.core_type = #tpu.core_type<tc>, window_params = [{transform_indices = @transform_0, window_bounds = array<i64: 64, 128>}, {transform_indices = @transform_1, window_bounds = array<i64: 128, 128>}, {transform_indices = @transform_2, window_bounds = array<i64: 1, 128>}, {transform_indices = @transform_3, window_bounds = array<i64: 64, 128>}]} {
    %c0 = arith.constant 0 : index
    %c0_0 = arith.constant 0 : index
    %0 = vector.load %arg2[%c0, %c0_0] : memref<64x128xf32, #tpu.memory_space<vmem>>, vector<64x128xf32>
    %1 = arith.truncf %0 : vector<64x128xf32> to vector<64x128xbf16>
    %c0_1 = arith.constant 0 : index
    %c0_2 = arith.constant 0 : index
    %2 = vector.load %arg3[%c0_1, %c0_2] : memref<128x128xbf16, #tpu.memory_space<vmem>>, vector<128x128xbf16>
    %cst = arith.constant dense<0.000000e+00> : vector<64x128xf32>
    %3 = tpu.matmul %1, %2, %cst {dimension_numbers = #tpu.dot_dimension_numbers<[1], [0], [0], [1], [0, 0, 1, 1], [], []>} : vector<64x128xbf16>, vector<128x128xbf16>, vector<64x128xf32> -> vector<64x128xf32>
    %c0_3 = arith.constant 0 : index
    %c0_4 = arith.constant 0 : index
    %4 = vector.load %arg4[%c0_3, %c0_4] : memref<1x128xf32, #tpu.memory_space<vmem>>, vector<1x128xf32>
    %5 = vector.broadcast %4 : vector<1x128xf32> to vector<64x128xf32>
    %6 = arith.addf %3, %5 : vector<64x128xf32>
    %c0_5 = arith.constant 0 : index
    %c0_6 = arith.constant 0 : index
    %7 = vector.load %arg5[%c0_5, %c0_6] : memref<64x128xf32, #tpu.memory_space<vmem>>, vector<64x128xf32>
    tpu.vector_store %arg5[%c0_5, %c0_6], %6 {strides = array<i32>} : memref<64x128xf32, #tpu.memory_space<vmem>>, vector<64x128xf32>,
    return
  }
  func.func @transform_0(%arg0: i32, %arg1: i32) -> (i32, i32) {
    %c0_i32 = arith.constant 0 : i32
    %c0_i32_0 = arith.constant 0 : i32
    return %arg0, %c0_i32 : i32, i32
  }
  func.func @transform_1(%arg0: i32, %arg1: i32) -> (i32, i32) {
    %c0_i32 = arith.constant 0 : i32
    %c0_i32_0 = arith.constant 0 : i32
    return %c0_i32, %arg1 : i32, i32
  }
  func.func @transform_2(%arg0: i32, %arg1: i32) -> (i32, i32) {
    %c0_i32 = arith.constant 0 : i32
    %c0_i32_0 = arith.constant 0 : i32
    return %c0_i32, %arg1 : i32, i32
  }
  func.func @transform_3(%arg0: i32, %arg1: i32) -> (i32, i32) {
    %c0_i32 = arith.constant 0 : i32
    return %arg0, %arg1 : i32, i32
  }
}

module attributes {stable_mosaic.version = 11 : i64} {
  func.func @gru_layer_kernel(%arg0: i32, %arg1: memref<8x8x128xf32, #tpu.memory_space<vmem>>, %arg2: memref<128x384xbf16, #tpu.memory_space<vmem>>, %arg3: memref<128x384xbf16, #tpu.memory_space<vmem>>, %arg4: memref<1x384xf32, #tpu.memory_space<vmem>>, %arg5: memref<1x384xf32, #tpu.memory_space<vmem>>, %arg6: memref<8x8x128xf32, #tpu.memory_space<vmem>>, %arg7: memref<8x128xf32, #tpu.memory_space<vmem>>) attributes {dimension_semantics = [#tpu.dimension_semantics<arbitrary>], iteration_bounds = array<i64: 1>, scalar_prefetch = 0 : i64, scratch_operands = 1 : i64, tpu.core_type = #tpu.core_type<tc>, window_params = [{transform_indices = @transform_0, window_bounds = array<i64: 8, 8, 128>}, {pipeline_mode = #tpu.pipeline_mode<synchronous>, transform_indices = @transform_1, window_bounds = array<i64: 128, 384>}, {pipeline_mode = #tpu.pipeline_mode<synchronous>, transform_indices = @transform_2, window_bounds = array<i64: 128, 384>}, {pipeline_mode = #tpu.pipeline_mode<synchronous>, transform_indices = @transform_3, window_bounds = array<i64: 1, 384>}, {pipeline_mode = #tpu.pipeline_mode<synchronous>, transform_indices = @transform_4, window_bounds = array<i64: 1, 384>}, {transform_indices = @transform_5, window_bounds = array<i64: 8, 8, 128>}]} {
    %c0_i32 = arith.constant 0 : i32
    %0 = arith.cmpi eq, %arg0, %c0_i32 : i32
    %1 = arith.extui %0 : i1 to i32
    %c0_i32_0 = arith.constant 0 : i32
    %2 = arith.cmpi ne, %1, %c0_i32_0 : i32
    scf.if %2 {
      %cst_64 = arith.constant 0.000000e+00 : f32
      %287 = vector.broadcast %cst_64 : f32 to vector<8x128xf32>
      %c0_65 = arith.constant 0 : index
      %c0_66 = arith.constant 0 : index
      %288 = vector.load %arg7[%c0_65, %c0_66] : memref<8x128xf32, #tpu.memory_space<vmem>>, vector<8x128xf32>
      tpu.vector_store %arg7[%c0_65, %c0_66], %287 {strides = array<i32>} : memref<8x128xf32, #tpu.memory_space<vmem>>, vector<8x128xf32>,
    } else {
    }
    %c0 = arith.constant 0 : index
    %c0_1 = arith.constant 0 : index
    %c0_2 = arith.constant 0 : index
    %3 = vector.load %arg1[%c0, %c0_1, %c0_2] : memref<8x8x128xf32, #tpu.memory_space<vmem>>, vector<8x8x128xf32>
    %4 = vector.shape_cast %3 : vector<8x8x128xf32> to vector<64x128xf32>
    %5 = arith.truncf %4 : vector<64x128xf32> to vector<64x128xbf16>
    %c0_3 = arith.constant 0 : index
    %c0_4 = arith.constant 0 : index
    %6 = vector.load %arg2[%c0_3, %c0_4] : memref<128x384xbf16, #tpu.memory_space<vmem>>, vector<128x384xbf16>
    %cst = arith.constant dense<0.000000e+00> : vector<64x384xf32>
    %7 = tpu.matmul %5, %6, %cst {dimension_numbers = #tpu.dot_dimension_numbers<[1], [0], [0], [1], [0, 0, 1, 1], [], []>} : vector<64x128xbf16>, vector<128x384xbf16>, vector<64x384xf32> -> vector<64x384xf32>
    %c0_5 = arith.constant 0 : index
    %c0_6 = arith.constant 0 : index
    %8 = vector.load %arg4[%c0_5, %c0_6] : memref<1x384xf32, #tpu.memory_space<vmem>>, vector<1x384xf32>
    %9 = vector.broadcast %8 : vector<1x384xf32> to vector<64x384xf32>
    %10 = arith.addf %7, %9 : vector<64x384xf32>
    %c0_7 = arith.constant 0 : index
    %c0_8 = arith.constant 0 : index
    %11 = vector.load %arg3[%c0_7, %c0_8] : memref<128x384xbf16, #tpu.memory_space<vmem>>, vector<128x384xbf16>
    %c0_9 = arith.constant 0 : index
    %c0_10 = arith.constant 0 : index
    %12 = vector.load %arg5[%c0_9, %c0_10] : memref<1x384xf32, #tpu.memory_space<vmem>>, vector<1x384xf32>
    %c0_11 = arith.constant 0 : index
    %c0_12 = arith.constant 0 : index
    %13 = vector.load %arg7[%c0_11, %c0_12] : memref<8x128xf32, #tpu.memory_space<vmem>>, vector<8x128xf32>
    %14 = vector.extract_strided_slice %10 {offsets = [0, 0], sizes = [8, 384], strides = [1, 1]} : vector<64x384xf32> to vector<8x384xf32>
    %15 = arith.truncf %13 : vector<8x128xf32> to vector<8x128xbf16>
    %cst_13 = arith.constant dense<0.000000e+00> : vector<8x384xf32>
    %16 = tpu.matmul %15, %11, %cst_13 {dimension_numbers = #tpu.dot_dimension_numbers<[1], [0], [0], [1], [0, 0, 1, 1], [], []>} : vector<8x128xbf16>, vector<128x384xbf16>, vector<8x384xf32> -> vector<8x384xf32>
    %17 = vector.broadcast %12 : vector<1x384xf32> to vector<8x384xf32>
    %18 = arith.addf %16, %17 : vector<8x384xf32>
    %19 = vector.extract_strided_slice %14 {offsets = [0, 0], sizes = [8, 128], strides = [1, 1]} : vector<8x384xf32> to vector<8x128xf32>
    %20 = vector.extract_strided_slice %18 {offsets = [0, 0], sizes = [8, 128], strides = [1, 1]} : vector<8x384xf32> to vector<8x128xf32>
    %21 = arith.addf %19, %20 : vector<8x128xf32>
    %22 = arith.negf %21 : vector<8x128xf32>
    %23 = math.exp %22 : vector<8x128xf32>
    %cst_14 = arith.constant 1.000000e+00 : f32
    %24 = vector.broadcast %cst_14 : f32 to vector<8x128xf32>
    %25 = arith.addf %24, %23 : vector<8x128xf32>
    %26 = arith.divf %24, %25 : vector<8x128xf32>
    %27 = vector.extract_strided_slice %14 {offsets = [0, 128], sizes = [8, 128], strides = [1, 1]} : vector<8x384xf32> to vector<8x128xf32>
    %28 = vector.extract_strided_slice %18 {offsets = [0, 128], sizes = [8, 128], strides = [1, 1]} : vector<8x384xf32> to vector<8x128xf32>
    %29 = arith.addf %27, %28 : vector<8x128xf32>
    %30 = arith.negf %29 : vector<8x128xf32>
    %31 = math.exp %30 : vector<8x128xf32>
    %cst_15 = arith.constant 1.000000e+00 : f32
    %32 = vector.broadcast %cst_15 : f32 to vector<8x128xf32>
    %33 = arith.addf %32, %31 : vector<8x128xf32>
    %34 = arith.divf %32, %33 : vector<8x128xf32>
    %35 = vector.extract_strided_slice %14 {offsets = [0, 256], sizes = [8, 128], strides = [1, 1]} : vector<8x384xf32> to vector<8x128xf32>
    %36 = vector.extract_strided_slice %18 {offsets = [0, 256], sizes = [8, 128], strides = [1, 1]} : vector<8x384xf32> to vector<8x128xf32>
    %37 = arith.mulf %26, %36 : vector<8x128xf32>
    %38 = arith.addf %35, %37 : vector<8x128xf32>
    %39 = math.tanh %38 : vector<8x128xf32>
    %cst_16 = arith.constant 1.000000e+00 : f32
    %40 = vector.broadcast %cst_16 : f32 to vector<8x128xf32>
    %41 = arith.subf %40, %34 : vector<8x128xf32>
    %42 = arith.mulf %41, %39 : vector<8x128xf32>
    %43 = arith.mulf %34, %13 : vector<8x128xf32>
    %44 = arith.addf %42, %43 : vector<8x128xf32>
    %c0_17 = arith.constant 0 : index
    %c0_18 = arith.constant 0 : index
    %c0_19 = arith.constant 0 : index
    %45 = vector.load %arg6[%c0_17, %c0_18, %c0_19] : memref<8x8x128xf32, #tpu.memory_space<vmem>>, vector<1x8x128xf32>
    %46 = vector.shape_cast %45 : vector<1x8x128xf32> to vector<8x128xf32>
    %47 = vector.shape_cast %44 : vector<8x128xf32> to vector<1x8x128xf32>
    tpu.vector_store %arg6[%c0_17, %c0_18, %c0_19], %47 {strides = array<i32>} : memref<8x8x128xf32, #tpu.memory_space<vmem>>, vector<1x8x128xf32>,
    %48 = vector.extract_strided_slice %10 {offsets = [8, 0], sizes = [8, 384], strides = [1, 1]} : vector<64x384xf32> to vector<8x384xf32>
    %49 = arith.truncf %44 : vector<8x128xf32> to vector<8x128xbf16>
    %cst_20 = arith.constant dense<0.000000e+00> : vector<8x384xf32>
    %50 = tpu.matmul %49, %11, %cst_20 {dimension_numbers = #tpu.dot_dimension_numbers<[1], [0], [0], [1], [0, 0, 1, 1], [], []>} : vector<8x128xbf16>, vector<128x384xbf16>, vector<8x384xf32> -> vector<8x384xf32>
    %51 = vector.broadcast %12 : vector<1x384xf32> to vector<8x384xf32>
    %52 = arith.addf %50, %51 : vector<8x384xf32>
    %53 = vector.extract_strided_slice %48 {offsets = [0, 0], sizes = [8, 128], strides = [1, 1]} : vector<8x384xf32> to vector<8x128xf32>
    %54 = vector.extract_strided_slice %52 {offsets = [0, 0], sizes = [8, 128], strides = [1, 1]} : vector<8x384xf32> to vector<8x128xf32>
    %55 = arith.addf %53, %54 : vector<8x128xf32>
    %56 = arith.negf %55 : vector<8x128xf32>
    %57 = math.exp %56 : vector<8x128xf32>
    %cst_21 = arith.constant 1.000000e+00 : f32
    %58 = vector.broadcast %cst_21 : f32 to vector<8x128xf32>
    %59 = arith.addf %58, %57 : vector<8x128xf32>
    %60 = arith.divf %58, %59 : vector<8x128xf32>
    %61 = vector.extract_strided_slice %48 {offsets = [0, 128], sizes = [8, 128], strides = [1, 1]} : vector<8x384xf32> to vector<8x128xf32>
    %62 = vector.extract_strided_slice %52 {offsets = [0, 128], sizes = [8, 128], strides = [1, 1]} : vector<8x384xf32> to vector<8x128xf32>
    %63 = arith.addf %61, %62 : vector<8x128xf32>
    %64 = arith.negf %63 : vector<8x128xf32>
    %65 = math.exp %64 : vector<8x128xf32>
    %cst_22 = arith.constant 1.000000e+00 : f32
    %66 = vector.broadcast %cst_22 : f32 to vector<8x128xf32>
    %67 = arith.addf %66, %65 : vector<8x128xf32>
    %68 = arith.divf %66, %67 : vector<8x128xf32>
    %69 = vector.extract_strided_slice %48 {offsets = [0, 256], sizes = [8, 128], strides = [1, 1]} : vector<8x384xf32> to vector<8x128xf32>
    %70 = vector.extract_strided_slice %52 {offsets = [0, 256], sizes = [8, 128], strides = [1, 1]} : vector<8x384xf32> to vector<8x128xf32>
    %71 = arith.mulf %60, %70 : vector<8x128xf32>
    %72 = arith.addf %69, %71 : vector<8x128xf32>
    %73 = math.tanh %72 : vector<8x128xf32>
    %cst_23 = arith.constant 1.000000e+00 : f32
    %74 = vector.broadcast %cst_23 : f32 to vector<8x128xf32>
    %75 = arith.subf %74, %68 : vector<8x128xf32>
    %76 = arith.mulf %75, %73 : vector<8x128xf32>
    %77 = arith.mulf %68, %44 : vector<8x128xf32>
    %78 = arith.addf %76, %77 : vector<8x128xf32>
    %c1 = arith.constant 1 : index
    %c0_24 = arith.constant 0 : index
    %c0_25 = arith.constant 0 : index
    %79 = vector.load %arg6[%c1, %c0_24, %c0_25] : memref<8x8x128xf32, #tpu.memory_space<vmem>>, vector<1x8x128xf32>
    %80 = vector.shape_cast %79 : vector<1x8x128xf32> to vector<8x128xf32>
    %81 = vector.shape_cast %78 : vector<8x128xf32> to vector<1x8x128xf32>
    tpu.vector_store %arg6[%c1, %c0_24, %c0_25], %81 {strides = array<i32>} : memref<8x8x128xf32, #tpu.memory_space<vmem>>, vector<1x8x128xf32>,
    %82 = vector.extract_strided_slice %10 {offsets = [16, 0], sizes = [8, 384], strides = [1, 1]} : vector<64x384xf32> to vector<8x384xf32>
    %83 = arith.truncf %78 : vector<8x128xf32> to vector<8x128xbf16>
    %cst_26 = arith.constant dense<0.000000e+00> : vector<8x384xf32>
    %84 = tpu.matmul %83, %11, %cst_26 {dimension_numbers = #tpu.dot_dimension_numbers<[1], [0], [0], [1], [0, 0, 1, 1], [], []>} : vector<8x128xbf16>, vector<128x384xbf16>, vector<8x384xf32> -> vector<8x384xf32>
    %85 = vector.broadcast %12 : vector<1x384xf32> to vector<8x384xf32>
    %86 = arith.addf %84, %85 : vector<8x384xf32>
    %87 = vector.extract_strided_slice %82 {offsets = [0, 0], sizes = [8, 128], strides = [1, 1]} : vector<8x384xf32> to vector<8x128xf32>
    %88 = vector.extract_strided_slice %86 {offsets = [0, 0], sizes = [8, 128], strides = [1, 1]} : vector<8x384xf32> to vector<8x128xf32>
    %89 = arith.addf %87, %88 : vector<8x128xf32>
    %90 = arith.negf %89 : vector<8x128xf32>
    %91 = math.exp %90 : vector<8x128xf32>
    %cst_27 = arith.constant 1.000000e+00 : f32
    %92 = vector.broadcast %cst_27 : f32 to vector<8x128xf32>
    %93 = arith.addf %92, %91 : vector<8x128xf32>
    %94 = arith.divf %92, %93 : vector<8x128xf32>
    %95 = vector.extract_strided_slice %82 {offsets = [0, 128], sizes = [8, 128], strides = [1, 1]} : vector<8x384xf32> to vector<8x128xf32>
    %96 = vector.extract_strided_slice %86 {offsets = [0, 128], sizes = [8, 128], strides = [1, 1]} : vector<8x384xf32> to vector<8x128xf32>
    %97 = arith.addf %95, %96 : vector<8x128xf32>
    %98 = arith.negf %97 : vector<8x128xf32>
    %99 = math.exp %98 : vector<8x128xf32>
    %cst_28 = arith.constant 1.000000e+00 : f32
    %100 = vector.broadcast %cst_28 : f32 to vector<8x128xf32>
    %101 = arith.addf %100, %99 : vector<8x128xf32>
    %102 = arith.divf %100, %101 : vector<8x128xf32>
    %103 = vector.extract_strided_slice %82 {offsets = [0, 256], sizes = [8, 128], strides = [1, 1]} : vector<8x384xf32> to vector<8x128xf32>
    %104 = vector.extract_strided_slice %86 {offsets = [0, 256], sizes = [8, 128], strides = [1, 1]} : vector<8x384xf32> to vector<8x128xf32>
    %105 = arith.mulf %94, %104 : vector<8x128xf32>
    %106 = arith.addf %103, %105 : vector<8x128xf32>
    %107 = math.tanh %106 : vector<8x128xf32>
    %cst_29 = arith.constant 1.000000e+00 : f32
    %108 = vector.broadcast %cst_29 : f32 to vector<8x128xf32>
    %109 = arith.subf %108, %102 : vector<8x128xf32>
    %110 = arith.mulf %109, %107 : vector<8x128xf32>
    %111 = arith.mulf %102, %78 : vector<8x128xf32>
    %112 = arith.addf %110, %111 : vector<8x128xf32>
    %c2 = arith.constant 2 : index
    %c0_30 = arith.constant 0 : index
    %c0_31 = arith.constant 0 : index
    %113 = vector.load %arg6[%c2, %c0_30, %c0_31] : memref<8x8x128xf32, #tpu.memory_space<vmem>>, vector<1x8x128xf32>
    %114 = vector.shape_cast %113 : vector<1x8x128xf32> to vector<8x128xf32>
    %115 = vector.shape_cast %112 : vector<8x128xf32> to vector<1x8x128xf32>
    tpu.vector_store %arg6[%c2, %c0_30, %c0_31], %115 {strides = array<i32>} : memref<8x8x128xf32, #tpu.memory_space<vmem>>, vector<1x8x128xf32>,
    %116 = vector.extract_strided_slice %10 {offsets = [24, 0], sizes = [8, 384], strides = [1, 1]} : vector<64x384xf32> to vector<8x384xf32>
    %117 = arith.truncf %112 : vector<8x128xf32> to vector<8x128xbf16>
    %cst_32 = arith.constant dense<0.000000e+00> : vector<8x384xf32>
    %118 = tpu.matmul %117, %11, %cst_32 {dimension_numbers = #tpu.dot_dimension_numbers<[1], [0], [0], [1], [0, 0, 1, 1], [], []>} : vector<8x128xbf16>, vector<128x384xbf16>, vector<8x384xf32> -> vector<8x384xf32>
    %119 = vector.broadcast %12 : vector<1x384xf32> to vector<8x384xf32>
    %120 = arith.addf %118, %119 : vector<8x384xf32>
    %121 = vector.extract_strided_slice %116 {offsets = [0, 0], sizes = [8, 128], strides = [1, 1]} : vector<8x384xf32> to vector<8x128xf32>
    %122 = vector.extract_strided_slice %120 {offsets = [0, 0], sizes = [8, 128], strides = [1, 1]} : vector<8x384xf32> to vector<8x128xf32>
    %123 = arith.addf %121, %122 : vector<8x128xf32>
    %124 = arith.negf %123 : vector<8x128xf32>
    %125 = math.exp %124 : vector<8x128xf32>
    %cst_33 = arith.constant 1.000000e+00 : f32
    %126 = vector.broadcast %cst_33 : f32 to vector<8x128xf32>
    %127 = arith.addf %126, %125 : vector<8x128xf32>
    %128 = arith.divf %126, %127 : vector<8x128xf32>
    %129 = vector.extract_strided_slice %116 {offsets = [0, 128], sizes = [8, 128], strides = [1, 1]} : vector<8x384xf32> to vector<8x128xf32>
    %130 = vector.extract_strided_slice %120 {offsets = [0, 128], sizes = [8, 128], strides = [1, 1]} : vector<8x384xf32> to vector<8x128xf32>
    %131 = arith.addf %129, %130 : vector<8x128xf32>
    %132 = arith.negf %131 : vector<8x128xf32>
    %133 = math.exp %132 : vector<8x128xf32>
    %cst_34 = arith.constant 1.000000e+00 : f32
    %134 = vector.broadcast %cst_34 : f32 to vector<8x128xf32>
    %135 = arith.addf %134, %133 : vector<8x128xf32>
    %136 = arith.divf %134, %135 : vector<8x128xf32>
    %137 = vector.extract_strided_slice %116 {offsets = [0, 256], sizes = [8, 128], strides = [1, 1]} : vector<8x384xf32> to vector<8x128xf32>
    %138 = vector.extract_strided_slice %120 {offsets = [0, 256], sizes = [8, 128], strides = [1, 1]} : vector<8x384xf32> to vector<8x128xf32>
    %139 = arith.mulf %128, %138 : vector<8x128xf32>
    %140 = arith.addf %137, %139 : vector<8x128xf32>
    %141 = math.tanh %140 : vector<8x128xf32>
    %cst_35 = arith.constant 1.000000e+00 : f32
    %142 = vector.broadcast %cst_35 : f32 to vector<8x128xf32>
    %143 = arith.subf %142, %136 : vector<8x128xf32>
    %144 = arith.mulf %143, %141 : vector<8x128xf32>
    %145 = arith.mulf %136, %112 : vector<8x128xf32>
    %146 = arith.addf %144, %145 : vector<8x128xf32>
    %c3 = arith.constant 3 : index
    %c0_36 = arith.constant 0 : index
    %c0_37 = arith.constant 0 : index
    %147 = vector.load %arg6[%c3, %c0_36, %c0_37] : memref<8x8x128xf32, #tpu.memory_space<vmem>>, vector<1x8x128xf32>
    %148 = vector.shape_cast %147 : vector<1x8x128xf32> to vector<8x128xf32>
    %149 = vector.shape_cast %146 : vector<8x128xf32> to vector<1x8x128xf32>
    tpu.vector_store %arg6[%c3, %c0_36, %c0_37], %149 {strides = array<i32>} : memref<8x8x128xf32, #tpu.memory_space<vmem>>, vector<1x8x128xf32>,
    %150 = vector.extract_strided_slice %10 {offsets = [32, 0], sizes = [8, 384], strides = [1, 1]} : vector<64x384xf32> to vector<8x384xf32>
    %151 = arith.truncf %146 : vector<8x128xf32> to vector<8x128xbf16>
    %cst_38 = arith.constant dense<0.000000e+00> : vector<8x384xf32>
    %152 = tpu.matmul %151, %11, %cst_38 {dimension_numbers = #tpu.dot_dimension_numbers<[1], [0], [0], [1], [0, 0, 1, 1], [], []>} : vector<8x128xbf16>, vector<128x384xbf16>, vector<8x384xf32> -> vector<8x384xf32>
    %153 = vector.broadcast %12 : vector<1x384xf32> to vector<8x384xf32>
    %154 = arith.addf %152, %153 : vector<8x384xf32>
    %155 = vector.extract_strided_slice %150 {offsets = [0, 0], sizes = [8, 128], strides = [1, 1]} : vector<8x384xf32> to vector<8x128xf32>
    %156 = vector.extract_strided_slice %154 {offsets = [0, 0], sizes = [8, 128], strides = [1, 1]} : vector<8x384xf32> to vector<8x128xf32>
    %157 = arith.addf %155, %156 : vector<8x128xf32>
    %158 = arith.negf %157 : vector<8x128xf32>
    %159 = math.exp %158 : vector<8x128xf32>
    %cst_39 = arith.constant 1.000000e+00 : f32
    %160 = vector.broadcast %cst_39 : f32 to vector<8x128xf32>
    %161 = arith.addf %160, %159 : vector<8x128xf32>
    %162 = arith.divf %160, %161 : vector<8x128xf32>
    %163 = vector.extract_strided_slice %150 {offsets = [0, 128], sizes = [8, 128], strides = [1, 1]} : vector<8x384xf32> to vector<8x128xf32>
    %164 = vector.extract_strided_slice %154 {offsets = [0, 128], sizes = [8, 128], strides = [1, 1]} : vector<8x384xf32> to vector<8x128xf32>
    %165 = arith.addf %163, %164 : vector<8x128xf32>
    %166 = arith.negf %165 : vector<8x128xf32>
    %167 = math.exp %166 : vector<8x128xf32>
    %cst_40 = arith.constant 1.000000e+00 : f32
    %168 = vector.broadcast %cst_40 : f32 to vector<8x128xf32>
    %169 = arith.addf %168, %167 : vector<8x128xf32>
    %170 = arith.divf %168, %169 : vector<8x128xf32>
    %171 = vector.extract_strided_slice %150 {offsets = [0, 256], sizes = [8, 128], strides = [1, 1]} : vector<8x384xf32> to vector<8x128xf32>
    %172 = vector.extract_strided_slice %154 {offsets = [0, 256], sizes = [8, 128], strides = [1, 1]} : vector<8x384xf32> to vector<8x128xf32>
    %173 = arith.mulf %162, %172 : vector<8x128xf32>
    %174 = arith.addf %171, %173 : vector<8x128xf32>
    %175 = math.tanh %174 : vector<8x128xf32>
    %cst_41 = arith.constant 1.000000e+00 : f32
    %176 = vector.broadcast %cst_41 : f32 to vector<8x128xf32>
    %177 = arith.subf %176, %170 : vector<8x128xf32>
    %178 = arith.mulf %177, %175 : vector<8x128xf32>
    %179 = arith.mulf %170, %146 : vector<8x128xf32>
    %180 = arith.addf %178, %179 : vector<8x128xf32>
    %c4 = arith.constant 4 : index
    %c0_42 = arith.constant 0 : index
    %c0_43 = arith.constant 0 : index
    %181 = vector.load %arg6[%c4, %c0_42, %c0_43] : memref<8x8x128xf32, #tpu.memory_space<vmem>>, vector<1x8x128xf32>
    %182 = vector.shape_cast %181 : vector<1x8x128xf32> to vector<8x128xf32>
    %183 = vector.shape_cast %180 : vector<8x128xf32> to vector<1x8x128xf32>
    tpu.vector_store %arg6[%c4, %c0_42, %c0_43], %183 {strides = array<i32>} : memref<8x8x128xf32, #tpu.memory_space<vmem>>, vector<1x8x128xf32>,
    %184 = vector.extract_strided_slice %10 {offsets = [40, 0], sizes = [8, 384], strides = [1, 1]} : vector<64x384xf32> to vector<8x384xf32>
    %185 = arith.truncf %180 : vector<8x128xf32> to vector<8x128xbf16>
    %cst_44 = arith.constant dense<0.000000e+00> : vector<8x384xf32>
    %186 = tpu.matmul %185, %11, %cst_44 {dimension_numbers = #tpu.dot_dimension_numbers<[1], [0], [0], [1], [0, 0, 1, 1], [], []>} : vector<8x128xbf16>, vector<128x384xbf16>, vector<8x384xf32> -> vector<8x384xf32>
    %187 = vector.broadcast %12 : vector<1x384xf32> to vector<8x384xf32>
    %188 = arith.addf %186, %187 : vector<8x384xf32>
    %189 = vector.extract_strided_slice %184 {offsets = [0, 0], sizes = [8, 128], strides = [1, 1]} : vector<8x384xf32> to vector<8x128xf32>
    %190 = vector.extract_strided_slice %188 {offsets = [0, 0], sizes = [8, 128], strides = [1, 1]} : vector<8x384xf32> to vector<8x128xf32>
    %191 = arith.addf %189, %190 : vector<8x128xf32>
    %192 = arith.negf %191 : vector<8x128xf32>
    %193 = math.exp %192 : vector<8x128xf32>
    %cst_45 = arith.constant 1.000000e+00 : f32
    %194 = vector.broadcast %cst_45 : f32 to vector<8x128xf32>
    %195 = arith.addf %194, %193 : vector<8x128xf32>
    %196 = arith.divf %194, %195 : vector<8x128xf32>
    %197 = vector.extract_strided_slice %184 {offsets = [0, 128], sizes = [8, 128], strides = [1, 1]} : vector<8x384xf32> to vector<8x128xf32>
    %198 = vector.extract_strided_slice %188 {offsets = [0, 128], sizes = [8, 128], strides = [1, 1]} : vector<8x384xf32> to vector<8x128xf32>
    %199 = arith.addf %197, %198 : vector<8x128xf32>
    %200 = arith.negf %199 : vector<8x128xf32>
    %201 = math.exp %200 : vector<8x128xf32>
    %cst_46 = arith.constant 1.000000e+00 : f32
    %202 = vector.broadcast %cst_46 : f32 to vector<8x128xf32>
    %203 = arith.addf %202, %201 : vector<8x128xf32>
    %204 = arith.divf %202, %203 : vector<8x128xf32>
    %205 = vector.extract_strided_slice %184 {offsets = [0, 256], sizes = [8, 128], strides = [1, 1]} : vector<8x384xf32> to vector<8x128xf32>
    %206 = vector.extract_strided_slice %188 {offsets = [0, 256], sizes = [8, 128], strides = [1, 1]} : vector<8x384xf32> to vector<8x128xf32>
    %207 = arith.mulf %196, %206 : vector<8x128xf32>
    %208 = arith.addf %205, %207 : vector<8x128xf32>
    %209 = math.tanh %208 : vector<8x128xf32>
    %cst_47 = arith.constant 1.000000e+00 : f32
    %210 = vector.broadcast %cst_47 : f32 to vector<8x128xf32>
    %211 = arith.subf %210, %204 : vector<8x128xf32>
    %212 = arith.mulf %211, %209 : vector<8x128xf32>
    %213 = arith.mulf %204, %180 : vector<8x128xf32>
    %214 = arith.addf %212, %213 : vector<8x128xf32>
    %c5 = arith.constant 5 : index
    %c0_48 = arith.constant 0 : index
    %c0_49 = arith.constant 0 : index
    %215 = vector.load %arg6[%c5, %c0_48, %c0_49] : memref<8x8x128xf32, #tpu.memory_space<vmem>>, vector<1x8x128xf32>
    %216 = vector.shape_cast %215 : vector<1x8x128xf32> to vector<8x128xf32>
    %217 = vector.shape_cast %214 : vector<8x128xf32> to vector<1x8x128xf32>
    tpu.vector_store %arg6[%c5, %c0_48, %c0_49], %217 {strides = array<i32>} : memref<8x8x128xf32, #tpu.memory_space<vmem>>, vector<1x8x128xf32>,
    %218 = vector.extract_strided_slice %10 {offsets = [48, 0], sizes = [8, 384], strides = [1, 1]} : vector<64x384xf32> to vector<8x384xf32>
    %219 = arith.truncf %214 : vector<8x128xf32> to vector<8x128xbf16>
    %cst_50 = arith.constant dense<0.000000e+00> : vector<8x384xf32>
    %220 = tpu.matmul %219, %11, %cst_50 {dimension_numbers = #tpu.dot_dimension_numbers<[1], [0], [0], [1], [0, 0, 1, 1], [], []>} : vector<8x128xbf16>, vector<128x384xbf16>, vector<8x384xf32> -> vector<8x384xf32>
    %221 = vector.broadcast %12 : vector<1x384xf32> to vector<8x384xf32>
    %222 = arith.addf %220, %221 : vector<8x384xf32>
    %223 = vector.extract_strided_slice %218 {offsets = [0, 0], sizes = [8, 128], strides = [1, 1]} : vector<8x384xf32> to vector<8x128xf32>
    %224 = vector.extract_strided_slice %222 {offsets = [0, 0], sizes = [8, 128], strides = [1, 1]} : vector<8x384xf32> to vector<8x128xf32>
    %225 = arith.addf %223, %224 : vector<8x128xf32>
    %226 = arith.negf %225 : vector<8x128xf32>
    %227 = math.exp %226 : vector<8x128xf32>
    %cst_51 = arith.constant 1.000000e+00 : f32
    %228 = vector.broadcast %cst_51 : f32 to vector<8x128xf32>
    %229 = arith.addf %228, %227 : vector<8x128xf32>
    %230 = arith.divf %228, %229 : vector<8x128xf32>
    %231 = vector.extract_strided_slice %218 {offsets = [0, 128], sizes = [8, 128], strides = [1, 1]} : vector<8x384xf32> to vector<8x128xf32>
    %232 = vector.extract_strided_slice %222 {offsets = [0, 128], sizes = [8, 128], strides = [1, 1]} : vector<8x384xf32> to vector<8x128xf32>
    %233 = arith.addf %231, %232 : vector<8x128xf32>
    %234 = arith.negf %233 : vector<8x128xf32>
    %235 = math.exp %234 : vector<8x128xf32>
    %cst_52 = arith.constant 1.000000e+00 : f32
    %236 = vector.broadcast %cst_52 : f32 to vector<8x128xf32>
    %237 = arith.addf %236, %235 : vector<8x128xf32>
    %238 = arith.divf %236, %237 : vector<8x128xf32>
    %239 = vector.extract_strided_slice %218 {offsets = [0, 256], sizes = [8, 128], strides = [1, 1]} : vector<8x384xf32> to vector<8x128xf32>
    %240 = vector.extract_strided_slice %222 {offsets = [0, 256], sizes = [8, 128], strides = [1, 1]} : vector<8x384xf32> to vector<8x128xf32>
    %241 = arith.mulf %230, %240 : vector<8x128xf32>
    %242 = arith.addf %239, %241 : vector<8x128xf32>
    %243 = math.tanh %242 : vector<8x128xf32>
    %cst_53 = arith.constant 1.000000e+00 : f32
    %244 = vector.broadcast %cst_53 : f32 to vector<8x128xf32>
    %245 = arith.subf %244, %238 : vector<8x128xf32>
    %246 = arith.mulf %245, %243 : vector<8x128xf32>
    %247 = arith.mulf %238, %214 : vector<8x128xf32>
    %248 = arith.addf %246, %247 : vector<8x128xf32>
    %c6 = arith.constant 6 : index
    %c0_54 = arith.constant 0 : index
    %c0_55 = arith.constant 0 : index
    %249 = vector.load %arg6[%c6, %c0_54, %c0_55] : memref<8x8x128xf32, #tpu.memory_space<vmem>>, vector<1x8x128xf32>
    %250 = vector.shape_cast %249 : vector<1x8x128xf32> to vector<8x128xf32>
    %251 = vector.shape_cast %248 : vector<8x128xf32> to vector<1x8x128xf32>
    tpu.vector_store %arg6[%c6, %c0_54, %c0_55], %251 {strides = array<i32>} : memref<8x8x128xf32, #tpu.memory_space<vmem>>, vector<1x8x128xf32>,
    %252 = vector.extract_strided_slice %10 {offsets = [56, 0], sizes = [8, 384], strides = [1, 1]} : vector<64x384xf32> to vector<8x384xf32>
    %253 = arith.truncf %248 : vector<8x128xf32> to vector<8x128xbf16>
    %cst_56 = arith.constant dense<0.000000e+00> : vector<8x384xf32>
    %254 = tpu.matmul %253, %11, %cst_56 {dimension_numbers = #tpu.dot_dimension_numbers<[1], [0], [0], [1], [0, 0, 1, 1], [], []>} : vector<8x128xbf16>, vector<128x384xbf16>, vector<8x384xf32> -> vector<8x384xf32>
    %255 = vector.broadcast %12 : vector<1x384xf32> to vector<8x384xf32>
    %256 = arith.addf %254, %255 : vector<8x384xf32>
    %257 = vector.extract_strided_slice %252 {offsets = [0, 0], sizes = [8, 128], strides = [1, 1]} : vector<8x384xf32> to vector<8x128xf32>
    %258 = vector.extract_strided_slice %256 {offsets = [0, 0], sizes = [8, 128], strides = [1, 1]} : vector<8x384xf32> to vector<8x128xf32>
    %259 = arith.addf %257, %258 : vector<8x128xf32>
    %260 = arith.negf %259 : vector<8x128xf32>
    %261 = math.exp %260 : vector<8x128xf32>
    %cst_57 = arith.constant 1.000000e+00 : f32
    %262 = vector.broadcast %cst_57 : f32 to vector<8x128xf32>
    %263 = arith.addf %262, %261 : vector<8x128xf32>
    %264 = arith.divf %262, %263 : vector<8x128xf32>
    %265 = vector.extract_strided_slice %252 {offsets = [0, 128], sizes = [8, 128], strides = [1, 1]} : vector<8x384xf32> to vector<8x128xf32>
    %266 = vector.extract_strided_slice %256 {offsets = [0, 128], sizes = [8, 128], strides = [1, 1]} : vector<8x384xf32> to vector<8x128xf32>
    %267 = arith.addf %265, %266 : vector<8x128xf32>
    %268 = arith.negf %267 : vector<8x128xf32>
    %269 = math.exp %268 : vector<8x128xf32>
    %cst_58 = arith.constant 1.000000e+00 : f32
    %270 = vector.broadcast %cst_58 : f32 to vector<8x128xf32>
    %271 = arith.addf %270, %269 : vector<8x128xf32>
    %272 = arith.divf %270, %271 : vector<8x128xf32>
    %273 = vector.extract_strided_slice %252 {offsets = [0, 256], sizes = [8, 128], strides = [1, 1]} : vector<8x384xf32> to vector<8x128xf32>
    %274 = vector.extract_strided_slice %256 {offsets = [0, 256], sizes = [8, 128], strides = [1, 1]} : vector<8x384xf32> to vector<8x128xf32>
    %275 = arith.mulf %264, %274 : vector<8x128xf32>
    %276 = arith.addf %273, %275 : vector<8x128xf32>
    %277 = math.tanh %276 : vector<8x128xf32>
    %cst_59 = arith.constant 1.000000e+00 : f32
    %278 = vector.broadcast %cst_59 : f32 to vector<8x128xf32>
    %279 = arith.subf %278, %272 : vector<8x128xf32>
    %280 = arith.mulf %279, %277 : vector<8x128xf32>
    %281 = arith.mulf %272, %248 : vector<8x128xf32>
    %282 = arith.addf %280, %281 : vector<8x128xf32>
    %c7 = arith.constant 7 : index
    %c0_60 = arith.constant 0 : index
    %c0_61 = arith.constant 0 : index
    %283 = vector.load %arg6[%c7, %c0_60, %c0_61] : memref<8x8x128xf32, #tpu.memory_space<vmem>>, vector<1x8x128xf32>
    %284 = vector.shape_cast %283 : vector<1x8x128xf32> to vector<8x128xf32>
    %285 = vector.shape_cast %282 : vector<8x128xf32> to vector<1x8x128xf32>
    tpu.vector_store %arg6[%c7, %c0_60, %c0_61], %285 {strides = array<i32>} : memref<8x8x128xf32, #tpu.memory_space<vmem>>, vector<1x8x128xf32>,
    %c0_62 = arith.constant 0 : index
    %c0_63 = arith.constant 0 : index
    %286 = vector.load %arg7[%c0_62, %c0_63] : memref<8x128xf32, #tpu.memory_space<vmem>>, vector<8x128xf32>
    tpu.vector_store %arg7[%c0_62, %c0_63], %282 {strides = array<i32>} : memref<8x128xf32, #tpu.memory_space<vmem>>, vector<8x128xf32>,
    return
  }
  func.func @transform_0(%arg0: i32) -> (i32, i32, i32) {
    %c0_i32 = arith.constant 0 : i32
    %c0_i32_0 = arith.constant 0 : i32
    %c0_i32_1 = arith.constant 0 : i32
    return %arg0, %c0_i32, %c0_i32_0 : i32, i32, i32
  }
  func.func @transform_1(%arg0: i32) -> (i32, i32) {
    %c0_i32 = arith.constant 0 : i32
    %c0_i32_0 = arith.constant 0 : i32
    %c0_i32_1 = arith.constant 0 : i32
    return %c0_i32, %c0_i32_0 : i32, i32
  }
  func.func @transform_2(%arg0: i32) -> (i32, i32) {
    %c0_i32 = arith.constant 0 : i32
    %c0_i32_0 = arith.constant 0 : i32
    %c0_i32_1 = arith.constant 0 : i32
    return %c0_i32, %c0_i32_0 : i32, i32
  }
  func.func @transform_3(%arg0: i32) -> (i32, i32) {
    %c0_i32 = arith.constant 0 : i32
    %c0_i32_0 = arith.constant 0 : i32
    %c0_i32_1 = arith.constant 0 : i32
    return %c0_i32, %c0_i32_0 : i32, i32
  }
  func.func @transform_4(%arg0: i32) -> (i32, i32) {
    %c0_i32 = arith.constant 0 : i32
    %c0_i32_0 = arith.constant 0 : i32
    %c0_i32_1 = arith.constant 0 : i32
    return %c0_i32, %c0_i32_0 : i32, i32
  }
  func.func @transform_5(%arg0: i32) -> (i32, i32, i32) {
    %c0_i32 = arith.constant 0 : i32
    %c0_i32_0 = arith.constant 0 : i32
    %c0_i32_1 = arith.constant 0 : i32
    return %arg0, %c0_i32, %c0_i32_0 : i32, i32, i32
  }
}

</mosaic_0001>

<bundles_post_ra>
// kernel: llama_simple_forward.5
= control target key start
LH: loop header
LB: loop body
LE: loop exit
PB: predicated region body
PF: predicated region fallthrough
CT: control target
= control target key end

     0   :  { %s339_s1 = inlined_call_operand.vmem [shape: bf16[128,128], index: 1, kind: input, shape index: {}]   ;;  %s340_s0 = inlined_call_operand.vmem [shape: f32[64,128], index: 0, kind: input, shape index: {}]   ;;  %s341_s2 = inlined_call_operand.vmem [shape: f32[1,128], index: 2, kind: input, shape index: {}]   ;;  %s342_s3 = inlined_call_operand.vmem [shape: f32[64,128], index: 3, kind: output, shape index: {}]  }
   0x1   :  { %v236_v0 = vld [vmem:[%s339_s1 + $0x38] sm:$0xff]   ;;  %v237_v1 = vld [vmem:[%s339_s1 + $0x30] sm:$0xff]   ;;  %v238_v2 = vld [vmem:[%s339_s1 + $0x28] sm:$0xff]  }
   0x2   :  { %196 = vmatprep.subr.bf16.mxu0 %v236_v0  ;;  %220 = vmatprep.subr.bf16.mxu1 %v236_v0  ;;  %v239_v3 = vld [vmem:[%s339_s1 + $0x20] sm:$0xff]   ;;  %v16_v5 = vld [vmem:[%s340_s0 + $0x8] sm:$0xff]  ;;  %v240_v10 = vld [vmem:[%s339_s1 + $0x18] sm:$0xff]  }
   0x3   :  { %197 = vmatpush3.bf16.msra.mxu0 %v236_v0  ;;  %228 = vmatpush3.bf16.msra.mxu1 %v236_v0  ;;  %v15_v4 = vld [vmem:[%s340_s0] sm:$0xff]  ;;  %v20_v8 = vld [vmem:[%s340_s0 + $0x28] sm:$0xff]  ;;  %v241_v11 = vld [vmem:[%s339_s1 + $0x10] sm:$0xff]  }
   0x4   :  { %198 = vmatprep.subr.bf16.mxu0 %v237_v1  ;;  %221 = vmatprep.subr.bf16.mxu1 %v237_v1  ;;  %v19_v6 = vld [vmem:[%s340_s0 + $0x20] sm:$0xff]  ;;  %v23_v7 = vpack.c.bf16 %v16_v5, %v15_v4  ;;  %v242_v12 = vld [vmem:[%s339_s1 + $0x8] sm:$0xff]   ;;  %v17_v14 = vld [vmem:[%s340_s0 + $0x10] sm:$0xff] }
   0x5   :  { %v25_v9 = vpack.c.bf16 %v20_v8, %v19_v6  ;;  %v243_v13 = vld [vmem:[%s339_s1] sm:$0xff]   ;;  %v18_v15 = vld [vmem:[%s340_s0 + $0x18] sm:$0xff]  ;;  %v21_v16 = vld [vmem:[%s340_s0 + $0x30] sm:$0xff] }
   0x6   :  { %212 = vmatprep.mubr.bf16.mxu0 %v23_v7  ;;  %v22_v17 = vld [vmem:[%s340_s0 + $0x38] sm:$0xff]  ;;  %v24_v18 = vpack.c.bf16 %v18_v15, %v17_v14  ;;  %v175_v20 = vld [vmem:[%s341_s2] ss:$0 sm:$0xff] }
   0x7   :  { %199 = vmatpush3.bf16.msra.mxu0 %v237_v1  ;;  %229 = vmatpush3.bf16.msra.mxu1 %v237_v1  ;;  %v26_v19 = vpack.c.bf16 %v22_v17, %v21_v16 }
   0x8   :  { %200 = vmatprep.subr.bf16.mxu0 %v238_v2  ;;  %222 = vmatprep.subr.bf16.mxu1 %v238_v2 }
   0x9   :  { %216 = vmatprep.mubr.bf16.mxu1 %v25_v9 }
   0xb   :  { %201 = vmatpush3.bf16.msra.mxu0 %v238_v2  ;;  %230 = vmatpush3.bf16.msra.mxu1 %v238_v2 }
   0xc   :  { %202 = vmatprep.subr.bf16.mxu0 %v239_v3  ;;  %223 = vmatprep.subr.bf16.mxu1 %v239_v3 }
   0xf   :  { %203 = vmatpush3.bf16.msra.mxu0 %v239_v3  ;;  %231 = vmatpush3.bf16.msra.mxu1 %v239_v3 }
  0x10   :  { %204 = vmatprep.subr.bf16.mxu0 %v240_v10  ;;  %224 = vmatprep.subr.bf16.mxu1 %v240_v10 }
  0x13   :  { %205 = vmatpush3.bf16.msra.mxu0 %v240_v10  ;;  %232 = vmatpush3.bf16.msra.mxu1 %v240_v10 }
  0x14   :  { %206 = vmatprep.subr.bf16.mxu0 %v241_v11  ;;  %225 = vmatprep.subr.bf16.mxu1 %v241_v11 }
  0x17   :  { %207 = vmatpush3.bf16.msra.mxu0 %v241_v11  ;;  %233 = vmatpush3.bf16.msra.mxu1 %v241_v11 }
  0x18   :  { %208 = vmatprep.subr.bf16.mxu0 %v242_v12  ;;  %226 = vmatprep.subr.bf16.mxu1 %v242_v12 }
  0x1b   :  { %209 = vmatpush3.bf16.msra.mxu0 %v242_v12  ;;  %234 = vmatpush3.bf16.msra.mxu1 %v242_v12 }
  0x1c   :  { %210 = vmatprep.subr.bf16.mxu0 %v243_v13  ;;  %227 = vmatprep.subr.bf16.mxu1 %v243_v13 }
  0x1f   :  { %211 = vmatpush3.bf16.msra.mxu0 %v243_v13  ;;  %235 = vmatpush3.bf16.msra.mxu1 %v243_v13 }
  0x22   :  { %213 = vmatmul.mubr.bf16.vlgmr.msra.gmra.mxu0 %v24_v18  ;;  %217 = vmatmul.mubr.bf16.vlgmr.msra.gmra.mxu1 %v26_v19 }
  0xe2   :  { %v214_v21 = vpop.f32.mrf.mxu0  ;;  %v218_v22 = vpop.f32.mrf.mxu1 }
  0xe3   :  { %v141_v23 = vadd.f32 %v214_v21, %v175_v20  ;;  %v157_v24 = vadd.f32 %v218_v22, %v175_v20 }
  0xe4   :  { %v132_v25 = vpop.f32.mrf.mxu0  ;;  %v148_v26 = vpop.f32.mrf.mxu1 }
  0xe5   :  { %165 = vst [vmem:[%s342_s3 + $0x10] sm:$0xff] %v141_v23  ;;  %169 = vst [vmem:[%s342_s3 + $0x30] sm:$0xff] %v157_v24  ;;  %v133_v27 = vadd.f32 %v175_v20, %v132_v25  ;;  %v149_v28 = vadd.f32 %v175_v20, %v148_v26 }
  0xe6   :  { %v215_v29 = vpop.f32.mrf.mxu0  ;;  %v219_v30 = vpop.f32.mrf.mxu1 }
  0xe7   :  { %163 = vst [vmem:[%s342_s3] sm:$0xff] %v133_v27  ;;  %167 = vst [vmem:[%s342_s3 + $0x20] sm:$0xff] %v149_v28  ;;  %v144_v31 = vadd.f32 %v215_v29, %v175_v20  ;;  %v160_v32 = vadd.f32 %v219_v30, %v175_v20 }
  0xe8   :  { %v135_v33 = vpop.f32.mrf.mxu0  ;;  %v151_v34 = vpop.f32.mrf.mxu1 }
  0xe9   :  { %166 = vst [vmem:[%s342_s3 + $0x18] sm:$0xff] %v144_v31  ;;  %170 = vst [vmem:[%s342_s3 + $0x38] sm:$0xff] %v160_v32  ;;  %v136_v35 = vadd.f32 %v175_v20, %v135_v33  ;;  %v152_v36 = vadd.f32 %v175_v20, %v151_v34 }
  0xeb   :  { %164 = vst [vmem:[%s342_s3 + $0x8] sm:$0xff] %v136_v35  ;;  %168 = vst [vmem:[%s342_s3 + $0x28] sm:$0xff] %v152_v36 }

// kernel: llama_simple_forward.3
= control target key start
LH: loop header
LB: loop body
LE: loop exit
PB: predicated region body
PF: predicated region fallthrough
CT: control target
= control target key end

     0   :  { %v2664_v1 = vmov 0   ;;  %v2666_v44 = vmov 0.0   ;;  %vm1888_vm0 = vmmov 0   ;;  %v1889_v60 = vmov 0.0|0.0   ;;  %s2658_s1 = inlined_call_operand.vmem [shape: bf16[128,384], index: 1, kind: input, shape index: {}]   ;;  %s2659_s0 = inlined_call_operand.vmem [shape: f32[8,8,128], index: 0, kind: input, shape index: {}]   ;;  %s2660_s2 = inlined_call_operand.vmem [shape: bf16[128,384], index: 2, kind: input, shape index: {}]   ;;  %s2661_s3 = inlined_call_operand.vmem [shape: f32[1,384], index: 3, kind: input, shape index: {}]   ;;  %s2662_s4 = inlined_call_operand.vmem [shape: f32[1,384], index: 4, kind: input, shape index: {}]   ;;  %s2663_s5 = inlined_call_operand.vmem [shape: f32[8,8,128], index: 5, kind: output, shape index: {}]  }
   0x1   :  { %v1718_v0 = vld [vmem:[%s2658_s1 + $0xac] ss:$12 sps:$4 sm:$0xff]   ;;  %247 = vmatprep.mubr.bf16.mxu0 %v2664_v1  ;;  %v1720_v2 = vld [vmem:[%s2658_s1 + $0xa8] ss:$12 sps:$4 sm:$0xff]   ;;  %v1723_v4 = vld [vmem:[%s2658_s1 + $0x90] ss:$12 sps:$4 sm:$0xff]   ;;  %v72_v63 = vlaneseq }
   0x2   :  { %215 = vmatprep.subr.bf16.mxu0 %v1718_v0  ;;  %v1721_v3 = vld [vmem:[%s2658_s1 + $0x94] ss:$12 sps:$4 sm:$0xff]   ;;  %v1724_v5 = vld [vmem:[%s2658_s1 + $0x7c] ss:$12 sps:$4 sm:$0xff]   ;;  %v1726_v6 = vld [vmem:[%s2658_s1 + $0x78] ss:$12 sps:$4 sm:$0xff]  }
   0x3   :  { %216 = vmatpush1.bf16.msra.mxu0 %v1720_v2  ;;  %v1727_v7 = vld [vmem:[%s2658_s1 + $0x64] ss:$12 sps:$4 sm:$0xff]   ;;  %v1729_v8 = vld [vmem:[%s2658_s1 + $0x60] ss:$12 sps:$4 sm:$0xff]   ;;  %v1732_v15 = vld [vmem:[%s2658_s1 + $0x48] ss:$12 sps:$4 sm:$0xff]  }
   0x4   :  { %217 = vmatprep.subr.bf16.mxu0 %v1721_v3  ;;  %v1730_v9 = vld [vmem:[%s2658_s1 + $0x4c] ss:$12 sps:$4 sm:$0xff]   ;;  %v1742_v10 = vld [vmem:[%s2658_s1 + $0xb0] ss:$12 sps:$4 sm:$0xff]   ;;  %v26_v11 = vld [vmem:[%s2659_s0] sm:$0xff]  ;;  %v2212_v0 = vshrl.u32 %v72_v63, 7 }
   0x5   :  { %v27_v12 = vld [vmem:[%s2659_s0 + $0x8] sm:$0xff]  ;;  %1530 = vmatprep.subr.bf16.mxu1 %v1742_v10  ;;  %v1745_v14 = vld [vmem:[%s2658_s1 + $0x98] ss:$12 sps:$4 sm:$0xff]   ;;  %v1733_v16 = vld [vmem:[%s2658_s1 + $0x34] ss:$12 sps:$4 sm:$0xff]  }
   0x6   :  { %v34_v13 = vpack.c.bf16 %v27_v12, %v26_v11  ;;  %1531 = vmatpush3.bf16.msra.mxu1 %v1742_v10  ;;  %v1749_v17 = vld [vmem:[%s2658_s1 + $0x80] ss:$12 sps:$4 sm:$0xff]   ;;  %v1735_v18 = vld [vmem:[%s2658_s1 + $0x30] ss:$12 sps:$4 sm:$0xff]   ;;  %v1753_v19 = vld [vmem:[%s2658_s1 + $0x68] ss:$12 sps:$4 sm:$0xff]  }
   0x7   :  { %218 = vmatpush1.bf16.msra.mxu0 %v1723_v4  ;;  %1532 = vmatprep.subr.bf16.mxu1 %v1745_v14  ;;  %v1736_v20 = vld [vmem:[%s2658_s1 + $0x1c] ss:$12 sps:$4 sm:$0xff]   ;;  %v1738_v21 = vld [vmem:[%s2658_s1 + $0x18] ss:$12 sps:$4 sm:$0xff]   ;;  %v1741_v24 = vld [vmem:[%s2658_s1] ss:$12 sps:$4 sm:$0xff]  }
   0x8   :  { %219 = vmatprep.subr.bf16.mxu0 %v1724_v5  ;;  %1546 = vmatprep.mubr.bf16.mxu1 %v34_v13  ;;  %v1757_v22 = vld [vmem:[%s2658_s1 + $0x50] ss:$12 sps:$4 sm:$0xff]   ;;  %v1761_v25 = vld [vmem:[%s2658_s1 + $0x38] ss:$12 sps:$4 sm:$0xff]   ;;  %v2001_v27 = vld [vmem:[%s2660_s2 + $0xa8] ss:$12 sps:$4 sm:$0xff]  }
   0x9   :  { %v1739_v23 = vld [vmem:[%s2658_s1 + $0x4] ss:$12 sps:$4 sm:$0xff]   ;;  %v1996_v26 = vld [vmem:[%s2660_s2 + $0xac] ss:$12 sps:$4 sm:$0xff]   ;;  %v2006_v28 = vld [vmem:[%s2660_s2 + $0x94] ss:$12 sps:$4 sm:$0xff]  }
   0xa   :  { %1533 = vmatpush3.bf16.msra.mxu1 %v1745_v14  ;;  %v1765_v29 = vld [vmem:[%s2658_s1 + $0x20] ss:$12 sps:$4 sm:$0xff]   ;;  %v2015_v30 = vld [vmem:[%s2660_s2 + $0x90] ss:$12 sps:$4 sm:$0xff]   ;;  %v1769_v33 = vld [vmem:[%s2658_s1 + $0x8] ss:$12 sps:$4 sm:$0xff]  }
   0xb   :  { %220 = vmatpush1.bf16.msra.mxu0 %v1726_v6  ;;  %1534 = vmatprep.subr.bf16.mxu1 %v1749_v17  ;;  %v28_v31 = vld [vmem:[%s2659_s0 + $0x10] sm:$0xff]  ;;  %v29_v32 = vld [vmem:[%s2659_s0 + $0x18] sm:$0xff]  ;;  %v30_v38 = vld [vmem:[%s2659_s0 + $0x20] sm:$0xff]  ;;  %v74_v2 = vsub.s32 0, %v2212_v0  ;;  %v78_v5 = vsub.s32 1, %v2212_v0 }
   0xc   :  { %221 = vmatprep.subr.bf16.mxu0 %v1727_v7  ;;  %v2032_v34 = vld [vmem:[%s2660_s2 + $0x7c] ss:$12 sps:$4 sm:$0xff]   ;;  %v35_v35 = vpack.c.bf16 %v29_v32, %v28_v31  ;;  %v2038_v36 = vld [vmem:[%s2660_s2 + $0x78] ss:$12 sps:$4 sm:$0xff]   ;;  %v2061_v41 = vld [vmem:[%s2660_s2 + $0x60] ss:$12 sps:$4 sm:$0xff]  }
   0xd   :  { %v2044_v37 = vld [vmem:[%s2660_s2 + $0x64] ss:$12 sps:$4 sm:$0xff]   ;;  %v31_v39 = vld [vmem:[%s2659_s0 + $0x28] sm:$0xff]  ;;  %v2088_v47 = vld [vmem:[%s2660_s2 + $0x34] ss:$12 sps:$4 sm:$0xff]  }
   0xe   :  { %1535 = vmatpush3.bf16.msra.mxu1 %v1749_v17  ;;  %v2055_v40 = vld [vmem:[%s2660_s2 + $0xb0] ss:$12 sps:$4 sm:$0xff]   ;;  %v36_v42 = vpack.c.bf16 %v31_v39, %v30_v38  ;;  %v2068_v43 = vld [vmem:[%s2660_s2 + $0x4c] ss:$12 sps:$4 sm:$0xff]   ;;  %v2081_v46 = vld [vmem:[%s2660_s2 + $0x48] ss:$12 sps:$4 sm:$0xff]  }
   0xf   :  { %222 = vmatpush1.bf16.msra.mxu0 %v1729_v8  ;;  %1536 = vmatprep.subr.bf16.mxu1 %v1753_v19  ;;  %v2075_v45 = vld [vmem:[%s2660_s2 + $0x98] ss:$12 sps:$4 sm:$0xff]   ;;  %v32_v48 = vld [vmem:[%s2659_s0 + $0x30] sm:$0xff]  ;;  %v2100_v50 = vld [vmem:[%s2660_s2 + $0x80] ss:$12 sps:$4 sm:$0xff]  }
  0x10   :  { %223 = vmatprep.subr.bf16.mxu0 %v1730_v9  ;;  %v33_v49 = vld [vmem:[%s2659_s0 + $0x38] sm:$0xff]  ;;  %v2120_v54 = vld [vmem:[%s2660_s2 + $0x68] ss:$12 sps:$4 sm:$0xff]   ;;  %v2135_v56 = vld [vmem:[%s2660_s2 + $0x4] ss:$12 sps:$4 sm:$0xff]   ;;  %v2668_v9 = vsub.s32 2, %v2212_v0 }
  0x11   :  { %v2106_v51 = vld [vmem:[%s2660_s2 + $0x30] ss:$12 sps:$4 sm:$0xff]   ;;  %v37_v52 = vpack.c.bf16 %v33_v49, %v32_v48  ;;  %v2128_v55 = vld [vmem:[%s2660_s2 + $0x18] ss:$12 sps:$4 sm:$0xff]   ;;  %v2147_v58 = vld [vmem:[%s2660_s2] ss:$12 sps:$4 sm:$0xff]  }
  0x12   :  { %1537 = vmatpush3.bf16.msra.mxu1 %v1753_v19  ;;  %v2113_v53 = vld [vmem:[%s2660_s2 + $0x1c] ss:$12 sps:$4 sm:$0xff]   ;;  %v2156_v59 = vld [vmem:[%s2660_s2 + $0x38] ss:$12 sps:$4 sm:$0xff]   ;;  %v2165_v61 = vld [vmem:[%s2660_s2 + $0x20] ss:$12 sps:$4 sm:$0xff]  }
  0x13   :  { %224 = vmatpush1.bf16.msra.mxu0 %v1732_v15  ;;  %1538 = vmatprep.subr.bf16.mxu1 %v1757_v22  ;;  %v2141_v57 = vld [vmem:[%s2660_s2 + $0x50] ss:$12 sps:$4 sm:$0xff]   ;;  %v2175_v62 = vld [vmem:[%s2660_s2 + $0x8] ss:$12 sps:$4 sm:$0xff]   ;;  %v70_v3 = vld [vmem:[%s2661_s3] sm:$0x7] }
  0x14   :  { %225 = vmatprep.subr.bf16.mxu0 %v1733_v16  ;;  %v75_v7 = vrot.slane %v70_v3, %v74_v2  ;;  %v79_v10 = vrot.slane %v70_v3, %v78_v5  ;;  %v2226_v15 = vrot.slane %v70_v3, %v2668_v9 }
  0x16   :  { %1539 = vmatpush3.bf16.msra.mxu1 %v1757_v22 }
  0x17   :  { %226 = vmatpush1.bf16.msra.mxu0 %v1735_v18  ;;  %1540 = vmatprep.subr.bf16.mxu1 %v1761_v25 }
  0x18   :  { %227 = vmatprep.subr.bf16.mxu0 %v1736_v20 }
  0x1a   :  { %1541 = vmatpush3.bf16.msra.mxu1 %v1761_v25 }
  0x1b   :  { %228 = vmatpush1.bf16.msra.mxu0 %v1738_v21  ;;  %1542 = vmatprep.subr.bf16.mxu1 %v1765_v29 }
  0x1c   :  { %229 = vmatprep.subr.bf16.mxu0 %v1739_v23 }
  0x1e   :  { %1543 = vmatpush3.bf16.msra.mxu1 %v1765_v29 }
  0x1f   :  { %230 = vmatpush1.bf16.msra.mxu0 %v1741_v24  ;;  %1544 = vmatprep.subr.bf16.mxu1 %v1769_v33 }
  0x20   :  { %532 = vmatprep.subr.bf16.mxu0 %v1996_v26 }
  0x22   :  { %248 = vmatmul.mubr.bf16.vlgmr.msra.gmra.mxu0 %v34_v13  ;;  %1545 = vmatpush3.bf16.msra.mxu1 %v1769_v33 }
  0x23   :  { %533 = vmatpush1.bf16.msra.mxu0 %v2001_v27  ;;  %257 = vmatprep.mubr.bf16.mxu0 %v2664_v1 }
  0x24   :  { %534 = vmatprep.subr.bf16.mxu0 %v2006_v28  ;;  %1554 = vmatprep.subr.bf16.mxu1 %v2666_v44 }
  0x25   :  { %1547 = vmatmul.mubr.bf16.vlgmr.msra.gmra.mxu1 %v35_v35 }
  0x26   :  { %1555 = vmatpush3.bf16.msra.mxu1 %v2055_v40  ;;  %1550 = vmatprep.mubr.bf16.mxu1 %v36_v42 }
  0x27   :  { %535 = vmatpush1.bf16.msra.mxu0 %v2015_v30  ;;  %1556 = vmatprep.subr.bf16.mxu1 %v2666_v44 }
  0x28   :  { %536 = vmatprep.subr.bf16.mxu0 %v2032_v34 }
  0x2a   :  { %258 = vmatmul.mubr.bf16.gmra.mxu0 %v35_v35  ;;  %1557 = vmatpush3.bf16.msra.mxu1 %v2075_v45 }
  0x2b   :  { %537 = vmatpush1.bf16.msra.mxu0 %v2038_v36  ;;  %267 = vmatprep.mubr.bf16.mxu0 %v2664_v1 }
  0x2c   :  { %538 = vmatprep.subr.bf16.mxu0 %v2044_v37  ;;  %1558 = vmatprep.subr.bf16.mxu1 %v2666_v44 }
  0x2d   :  { %1551 = vmatmul.mubr.bf16.gmra.mxu1 %v37_v52 }
  0x2e   :  { %1559 = vmatpush3.bf16.msra.mxu1 %v2100_v50  ;;  %1570 = vmatprep.mubr.msk.bf16.mxu1 %vm1888_vm0, %v2666_v44 }
  0x2f   :  { %539 = vmatpush1.bf16.msra.mxu0 %v2061_v41  ;;  %1560 = vmatprep.subr.bf16.mxu1 %v2666_v44 }
  0x30   :  { %540 = vmatprep.subr.bf16.mxu0 %v2068_v43 }
  0x32   :  { %268 = vmatmul.mubr.bf16.gmra.mxu0 %v36_v42  ;;  %1561 = vmatpush3.bf16.msra.mxu1 %v2120_v54 }
  0x33   :  { %541 = vmatpush1.bf16.msra.mxu0 %v2081_v46  ;;  %277 = vmatprep.mubr.bf16.mxu0 %v2664_v1 }
  0x34   :  { %542 = vmatprep.subr.bf16.mxu0 %v2088_v47  ;;  %1562 = vmatprep.subr.bf16.mxu1 %v2666_v44 }
  0x36   :  { %1563 = vmatpush3.bf16.msra.mxu1 %v2141_v57 }
  0x37   :  { %543 = vmatpush1.bf16.msra.mxu0 %v2106_v51  ;;  %1564 = vmatprep.subr.bf16.mxu1 %v2666_v44 }
  0x38   :  { %544 = vmatprep.subr.bf16.mxu0 %v2113_v53 }
  0x3a   :  { %278 = vmatmul.mubr.bf16.gmra.mxu0 %v37_v52  ;;  %1565 = vmatpush3.bf16.msra.mxu1 %v2156_v59 }
  0x3b   :  { %545 = vmatpush1.bf16.msra.mxu0 %v2128_v55  ;;  %564 = vmatprep.mubr.bf16.mxu0 %v2664_v1 }
  0x3c   :  { %546 = vmatprep.subr.bf16.mxu0 %v2135_v56  ;;  %1566 = vmatprep.subr.bf16.mxu1 %v2666_v44 }
  0x3e   :  { %1567 = vmatpush3.bf16.msra.mxu1 %v2165_v61 }
  0x3f   :  { %547 = vmatpush1.bf16.msra.mxu0 %v2147_v58  ;;  %1568 = vmatprep.subr.bf16.mxu1 %v2666_v44 }
  0x40   :  { %636 = vmatprep.subr.bf16.mxu0 %v1996_v26 }
  0x42   :  { %565 = vmatmul.mubr.bf16.vlgmr.msra.gmra.mxu0 %v1889_v60  ;;  %1569 = vmatpush3.bf16.msra.mxu1 %v2175_v62 }
  0x43   :  { %637 = vmatpush1.bf16.msra.mxu0 %v2001_v27  ;;  %668 = vmatprep.mubr.bf16.mxu0 %v2664_v1 }
  0x44   :  { %638 = vmatprep.subr.bf16.mxu0 %v2006_v28  ;;  %1574 = vmatprep.subr.bf16.mxu1 %v2666_v44 }
  0x45   :  { %1571 = vmatmul.mubr.bf16.vlgmr.msra.gmra.mxu1 %v1889_v60 }
  0x46   :  { %1575 = vmatpush3.bf16.msra.mxu1 %v2055_v40  ;;  %1590 = vmatprep.mubr.msk.bf16.mxu1 %vm1888_vm0, %v2666_v44 }
  0x47   :  { %639 = vmatpush1.bf16.msra.mxu0 %v2015_v30  ;;  %1576 = vmatprep.subr.bf16.mxu1 %v2666_v44 }
  0x48   :  { %640 = vmatprep.subr.bf16.mxu0 %v2032_v34 }
  0x4a   :  { %1577 = vmatpush3.bf16.msra.mxu1 %v2075_v45 }
  0x4b   :  { %641 = vmatpush1.bf16.msra.mxu0 %v2038_v36  ;;  %1578 = vmatprep.subr.bf16.mxu1 %v2666_v44 }
  0x4c   :  { %642 = vmatprep.subr.bf16.mxu0 %v2044_v37 }
  0x4e   :  { %1579 = vmatpush3.bf16.msra.mxu1 %v2100_v50 }
  0x4f   :  { %643 = vmatpush1.bf16.msra.mxu0 %v2061_v41  ;;  %1580 = vmatprep.subr.bf16.mxu1 %v2666_v44 }
  0x50   :  { %644 = vmatprep.subr.bf16.mxu0 %v2068_v43 }
  0x52   :  { %1581 = vmatpush3.bf16.msra.mxu1 %v2120_v54 }
  0x53   :  { %645 = vmatpush1.bf16.msra.mxu0 %v2081_v46  ;;  %1582 = vmatprep.subr.bf16.mxu1 %v2666_v44 }
  0x54   :  { %646 = vmatprep.subr.bf16.mxu0 %v2088_v47 }
  0x56   :  { %1583 = vmatpush3.bf16.msra.mxu1 %v2141_v57 }
  0x57   :  { %647 = vmatpush1.bf16.msra.mxu0 %v2106_v51  ;;  %1584 = vmatprep.subr.bf16.mxu1 %v2666_v44 }
  0x58   :  { %648 = vmatprep.subr.bf16.mxu0 %v2113_v53 }
  0x5a   :  { %1585 = vmatpush3.bf16.msra.mxu1 %v2156_v59 }
  0x5b   :  { %649 = vmatpush1.bf16.msra.mxu0 %v2128_v55  ;;  %1586 = vmatprep.subr.bf16.mxu1 %v2666_v44 }
  0x5c   :  { %650 = vmatprep.subr.bf16.mxu0 %v2135_v56 }
  0x5e   :  { %1587 = vmatpush3.bf16.msra.mxu1 %v2165_v61 }
  0x5f   :  { %651 = vmatpush1.bf16.msra.mxu0 %v2147_v58  ;;  %1588 = vmatprep.subr.bf16.mxu1 %v2666_v44 }
  0x60   :  { %741 = vmatprep.subr.bf16.mxu0 %v1996_v26 }
  0x62   :  { %1589 = vmatpush3.bf16.msra.mxu1 %v2175_v62 }
  0x63   :  { %1594 = vmatprep.subr.bf16.mxu1 %v2666_v44 }
  0xe2   :  { %v249_v4 = vpop.f32.mrf.mxu0 }
  0xe3   :  { %v250_v1 = vadd.f32 %v249_v4, %v75_v7 }
  0xe4   :  { %v251_v6 = vpop.f32.mrf.mxu0 }
  0xe5   :  { %v1548_v19 = vpop.f32.mrf.mxu1 }
  0xe6   :  { %v253_v8 = vpop.f32.mrf.mxu0  ;;  %v2233_v21 = vadd.f32 %v1548_v19, %v2226_v15 }
  0xe7   :  { %v2220_v11 = vadd.f32 %v253_v8, %v75_v7  ;;  %v322_v23 = vpop.f32.mrf.mxu1 }
  0xe8   :  { %v255_v12 = vpop.f32.mrf.mxu0 }
  0xe9   :  { %v2222_v13 = vadd.f32 %v255_v12, %v79_v10  ;;  %v1549_v29 = vpop.f32.mrf.mxu1 }
  0xea   :  { %v259_v14 = vpop.f32.mrf.mxu0  ;;  %v2240_v32 = vadd.f32 %v1549_v29, %v2226_v15 }
  0xeb   :  { %v2228_v16 = vadd.f32 %v259_v14, %v75_v7  ;;  %v325_v35 = vpop.f32.mrf.mxu1 }
  0xec   :  { %v261_v17 = vpop.f32.mrf.mxu0  ;;  %v2245_v39 = vadd.f32 %v325_v35, %v2226_v15 }
  0xed   :  { %v2230_v18 = vadd.f32 %v261_v17, %v79_v10  ;;  %v1552_v48 = vpop.f32.mrf.mxu1 }
  0xee   :  { %v263_v20 = vpop.f32.mrf.mxu0  ;;  %v2250_v52 = vadd.f32 %v1552_v48, %v2226_v15 }
  0xef   :  { %v2235_v22 = vadd.f32 %v263_v20, %v75_v7  ;;  %v338_v63 = vpop.f32.mrf.mxu1 }
  0xf0   :  { %v265_v24 = vpop.f32.mrf.mxu0  ;;  %2669 = vst [vmem:[#allocation3_spill] sm:$0xff] %v2250_v52  ;;  %v2255_v8 = vadd.f32 %v338_v63, %v2226_v15 }
  0xf1   :  { %v2237_v25 = vadd.f32 %v265_v24, %v79_v10  ;;  %v1553_v14 = vpop.f32.mrf.mxu1 }
  0xf2   :  { %v269_v31 = vpop.f32.mrf.mxu0  ;;  %v2260_v19 = vadd.f32 %v1553_v14, %v2226_v15 }
  0xf3   :  { %v2242_v33 = vadd.f32 %v269_v31, %v75_v7  ;;  %v341_v24 = vpop.f32.mrf.mxu1  ;;  %v385_v31 = vld [vmem:[%s2662_s4] sm:$0x7] }
  0xf4   :  { %v271_v38 = vpop.f32.mrf.mxu0  ;;  %2670 = vst [vmem:[#allocation4_spill] sm:$0xff] %v2260_v19  ;;  %v2268_v35 = vadd.f32 %v341_v24, %v2226_v15  ;;  %v2274_v63 = vrot.slane %v385_v31, %v74_v2  ;;  %v2279_v9 = vrot.slane %v385_v31, %v78_v5  ;;  %v2676_v5 = vsub.s32 2, %v2212_v0 }
  0xf5   :  { %v2247_v42 = vadd.f32 %v271_v38, %v79_v10 }
  0xf6   :  { %v273_v49 = vpop.f32.mrf.mxu0  ;;  %2672 = vst [vmem:[#allocation6_spill] sm:$0xff] %v2268_v35 }
  0xf7   :  { %v2252_v60 = vadd.f32 %v273_v49, %v75_v7 }
  0xf8   :  { %v275_v3 = vpop.f32.mrf.mxu0 }
  0xf9   :  { %v2257_v12 = vadd.f32 %v275_v3, %v79_v10 }
  0xfa   :  { %v279_v17 = vpop.f32.mrf.mxu0 }
  0xfb   :  { %v2262_v20 = vadd.f32 %v279_v17, %v75_v7 }
  0xfc   :  { %v281_v29 = vpop.f32.mrf.mxu0 }
  0xfd   :  { %2671 = vst [vmem:[#allocation5_spill] sm:$0xff] %v2262_v20  ;;  %v2270_v38 = vadd.f32 %v281_v29, %v79_v10 }
  0xfe   :  { %v283_v48 = vpop.f32.mrf.mxu0 }
  0xff   :  { %2673 = vst [vmem:[#allocation7_spill] sm:$0xff] %v2270_v38  ;;  %v2272_v49 = vadd.f32 %v283_v48, %v75_v7  ;;  %v252_v48 = vadd.f32 %v251_v6, %v79_v10 }
 0x100   :  { %v285_v3 = vpop.f32.mrf.mxu0 }
 0x101   :  { %2674 = vst [vmem:[#allocation8_spill] sm:$0xff] %v2272_v49  ;;  %v2276_v14 = vadd.f32 %v285_v3, %v79_v10  ;;  %v323_v10 = vadd.f32 %v322_v23, %v2226_v15  ;;  %v2677_v15 = vmov 0.0   ;;  %v2678_v23 = vmov 0  }
 0x102   :  { %v566_v17 = vpop.f32.mrf.mxu0 }
 0x103   :  { %2675 = vst [vmem:[#allocation9_spill] sm:$0xff] %v2276_v14  ;;  %v567_v44 = vadd.f32 %v566_v17, %v2274_v63 }
 0x104   :  { %v568_v19 = vpop.f32.mrf.mxu0 }
 0x105   :  { %v613_v52 = vadd.f32 %v567_v44, %v250_v1  ;;  %v569_v29 = vadd.f32 %v568_v19, %v2279_v9  ;;  %v607_v49 = vpop.f32.mrf.mxu1  ;;  %v2284_v1 = vrot.slane %v385_v31, %v2676_v5 }
 0x106   :  { %v570_v24 = vpop.f32.mrf.mxu0 }
 0x107   :  { %v1423_v20 = vmul.f32 -1.442695, %v613_v52  ;;  %v620_v2 = vadd.f32 %v569_v29, %v252_v48  ;;  %v1572_v3 = vpop.f32.mrf.mxu1  ;;  %v608_v19 = vadd.f32 %v607_v49, %v2284_v1 }
 0x108   :  { %v571_v38 = vpop.f32.mrf.mxu0 }
 0x109   :  { %1782 = vpow2.f32 %v1423_v20  ;;  %v1424_v35 = vmul.f32 -1.442695, %v620_v2  ;;  %v610_v14 = vpop.f32.mrf.mxu1 }
 0x10b   :  { %1784 = vpow2.f32 %v1424_v35  ;;  %v1573_v4 = vpop.f32.mrf.mxu1 }
 0x116   :  { %v1783_v7 = vpop.eup %1782 }
 0x117   :  { %v617_v17 = vadd.f32 1.0, %v1783_v7 }
 0x118   :  { %v1785_v44 = vpop.eup %1784 }
 0x119   :  { %1786 = vrcp.f32 %v617_v17  ;;  %v624_v52 = vadd.f32 1.0, %v1785_v44 }
 0x11b   :  { %1788 = vrcp.f32 %v624_v52 }
 0x126   :  { %v1787_v6 = vpop.eup %1786 }
 0x127   :  { %v627_v20 = vmul.f32 %v1787_v6, %v608_v19 }
 0x128   :  { %v1789_v35 = vpop.eup %1788 }
 0x129   :  { %v628_v38 = vadd.f32 %v627_v20, %v323_v10  ;;  %v630_v14 = vsub.f32 1.0, %v1789_v35  ;;  %v632_v48 = vmul.f32 0.0, %v1789_v35 }
 0x12b   :  { %1790 = vtanh.f32 %v628_v38 }
 0x138   :  { %v1791_v24 = vpop.eup %1790 }
 0x139   :  { %v631_v29 = vmul.f32 %v1791_v24, %v630_v14 }
 0x13b   :  { %v2288_v2 = vadd.f32 %v632_v48, %v631_v29 }
 0x13d   :  { %634 = vst [vmem:[%s2663_s5] sm:$0xff] %v2288_v2  ;;  %v635_v0 = vpack.c.bf16 %v2288_v2, %v2288_v2 }
 0x13f   :  { %669 = vmatmul.mubr.bf16.vlgmr.msra.gmra.mxu0 %v635_v0  ;;  %1591 = vmatmul.mubr.bf16.vlgmr.msra.gmra.mxu1 %v635_v0 }
 0x140   :  { %742 = vmatpush1.bf16.msra.mxu0 %v2001_v27  ;;  %1595 = vmatpush3.bf16.msra.mxu1 %v2055_v40 }
 0x141   :  { %743 = vmatprep.subr.bf16.mxu0 %v2006_v28  ;;  %1596 = vmatprep.subr.bf16.mxu1 %v2677_v15 }
 0x142   :  { %773 = vmatprep.mubr.bf16.mxu0 %v2678_v23  ;;  %1610 = vmatprep.mubr.msk.bf16.mxu1 %vm1888_vm0, %v2677_v15 }
 0x144   :  { %744 = vmatpush1.bf16.msra.mxu0 %v2015_v30  ;;  %1597 = vmatpush3.bf16.msra.mxu1 %v2075_v45 }
 0x145   :  { %745 = vmatprep.subr.bf16.mxu0 %v2032_v34  ;;  %1598 = vmatprep.subr.bf16.mxu1 %v2677_v15 }
 0x148   :  { %746 = vmatpush1.bf16.msra.mxu0 %v2038_v36  ;;  %1599 = vmatpush3.bf16.msra.mxu1 %v2100_v50 }
 0x149   :  { %747 = vmatprep.subr.bf16.mxu0 %v2044_v37  ;;  %1600 = vmatprep.subr.bf16.mxu1 %v2677_v15 }
 0x14c   :  { %748 = vmatpush1.bf16.msra.mxu0 %v2061_v41  ;;  %1601 = vmatpush3.bf16.msra.mxu1 %v2120_v54 }
 0x14d   :  { %749 = vmatprep.subr.bf16.mxu0 %v2068_v43  ;;  %1602 = vmatprep.subr.bf16.mxu1 %v2677_v15 }
 0x150   :  { %750 = vmatpush1.bf16.msra.mxu0 %v2081_v46  ;;  %1603 = vmatpush3.bf16.msra.mxu1 %v2141_v57 }
 0x151   :  { %751 = vmatprep.subr.bf16.mxu0 %v2088_v47  ;;  %1604 = vmatprep.subr.bf16.mxu1 %v2677_v15 }
 0x154   :  { %752 = vmatpush1.bf16.msra.mxu0 %v2106_v51  ;;  %1605 = vmatpush3.bf16.msra.mxu1 %v2156_v59 }
 0x155   :  { %753 = vmatprep.subr.bf16.mxu0 %v2113_v53  ;;  %1606 = vmatprep.subr.bf16.mxu1 %v2677_v15 }
 0x158   :  { %754 = vmatpush1.bf16.msra.mxu0 %v2128_v55  ;;  %1607 = vmatpush3.bf16.msra.mxu1 %v2165_v61 }
 0x159   :  { %755 = vmatprep.subr.bf16.mxu0 %v2135_v56  ;;  %1608 = vmatprep.subr.bf16.mxu1 %v2677_v15 }
 0x15c   :  { %756 = vmatpush1.bf16.msra.mxu0 %v2147_v58  ;;  %1609 = vmatpush3.bf16.msra.mxu1 %v2175_v62 }
 0x15d   :  { %846 = vmatprep.subr.bf16.mxu0 %v1996_v26  ;;  %1614 = vmatprep.subr.bf16.mxu1 %v2677_v15 }
 0x1ff   :  { %v670_v31 = vpop.f32.mrf.mxu0  ;;  %v711_v49 = vpop.f32.mrf.mxu1 }
 0x200   :  { %v671_v3 = vadd.f32 %v670_v31, %v2274_v63  ;;  %v712_v48 = vadd.f32 %v711_v49, %v2284_v1 }
 0x201   :  { %v672_v4 = vpop.f32.mrf.mxu0  ;;  %v1592_v7 = vpop.f32.mrf.mxu1 }
 0x202   :  { %v717_v17 = vadd.f32 %v671_v3, %v2220_v11  ;;  %v673_v19 = vadd.f32 %v672_v4, %v2279_v9 }
 0x203   :  { %v674_v5 = vpop.f32.mrf.mxu0  ;;  %v714_v44 = vpop.f32.mrf.mxu1 }
 0x204   :  { %v1425_v52 = vmul.f32 -1.442695, %v717_v17  ;;  %v724_v20 = vadd.f32 %v673_v19, %v2222_v13 }
 0x205   :  { %v675_v6 = vpop.f32.mrf.mxu0  ;;  %v1593_v10 = vpop.f32.mrf.mxu1 }
 0x206   :  { %1792 = vpow2.f32 %v1425_v52  ;;  %v1426_v38 = vmul.f32 -1.442695, %v724_v20 }
 0x208   :  { %1794 = vpow2.f32 %v1426_v38 }
 0x213   :  { %v1793_v35 = vpop.eup %1792 }
 0x214   :  { %v721_v14 = vadd.f32 1.0, %v1793_v35 }
 0x215   :  { %v1795_v24 = vpop.eup %1794 }
 0x216   :  { %1796 = vrcp.f32 %v721_v14  ;;  %v728_v29 = vadd.f32 1.0, %v1795_v24 }
 0x218   :  { %1798 = vrcp.f32 %v728_v29 }
 0x223   :  { %v1797_v11 = vpop.eup %1796 }
 0x224   :  { %v731_v0 = vmul.f32 %v1797_v11, %v712_v48 }
 0x225   :  { %v1799_v3 = vpop.eup %1798 }
 0x226   :  { %v732_v31 = vadd.f32 %v731_v0, %v2245_v39  ;;  %v734_v4 = vsub.f32 1.0, %v1799_v3  ;;  %v736_v13 = vmul.f32 %v1799_v3, %v2288_v2 }
 0x228   :  { %1800 = vtanh.f32 %v732_v31 }
 0x235   :  { %v1801_v7 = vpop.eup %1800 }
 0x236   :  { %v735_v17 = vmul.f32 %v1801_v7, %v734_v4 }
 0x238   :  { %v2338_v5 = vadd.f32 %v736_v13, %v735_v17 }
 0x23a   :  { %1427 = vst [vmem:[%s2663_s5 + $0x8] sm:$0xff] %v2338_v5  ;;  %v740_v49 = vpack.c.bf16 %v2338_v5, %v2338_v5 }
 0x23c   :  { %774 = vmatmul.mubr.bf16.vlgmr.msra.gmra.mxu0 %v740_v49  ;;  %1611 = vmatmul.mubr.bf16.vlgmr.msra.gmra.mxu1 %v740_v49 }
 0x23d   :  { %847 = vmatpush1.bf16.msra.mxu0 %v2001_v27  ;;  %1615 = vmatpush3.bf16.msra.mxu1 %v2055_v40 }
 0x23e   :  { %848 = vmatprep.subr.bf16.mxu0 %v2006_v28  ;;  %1616 = vmatprep.subr.bf16.mxu1 %v2677_v15 }
 0x23f   :  { %878 = vmatprep.mubr.bf16.mxu0 %v2678_v23  ;;  %1630 = vmatprep.mubr.msk.bf16.mxu1 %vm1888_vm0, %v2677_v15 }
 0x241   :  { %849 = vmatpush1.bf16.msra.mxu0 %v2015_v30  ;;  %1617 = vmatpush3.bf16.msra.mxu1 %v2075_v45 }
 0x242   :  { %850 = vmatprep.subr.bf16.mxu0 %v2032_v34  ;;  %1618 = vmatprep.subr.bf16.mxu1 %v2677_v15 }
 0x245   :  { %851 = vmatpush1.bf16.msra.mxu0 %v2038_v36  ;;  %1619 = vmatpush3.bf16.msra.mxu1 %v2100_v50 }
 0x246   :  { %852 = vmatprep.subr.bf16.mxu0 %v2044_v37  ;;  %1620 = vmatprep.subr.bf16.mxu1 %v2677_v15 }
 0x249   :  { %853 = vmatpush1.bf16.msra.mxu0 %v2061_v41  ;;  %1621 = vmatpush3.bf16.msra.mxu1 %v2120_v54 }
 0x24a   :  { %854 = vmatprep.subr.bf16.mxu0 %v2068_v43  ;;  %1622 = vmatprep.subr.bf16.mxu1 %v2677_v15 }
 0x24d   :  { %855 = vmatpush1.bf16.msra.mxu0 %v2081_v46  ;;  %1623 = vmatpush3.bf16.msra.mxu1 %v2141_v57 }
 0x24e   :  { %856 = vmatprep.subr.bf16.mxu0 %v2088_v47  ;;  %1624 = vmatprep.subr.bf16.mxu1 %v2677_v15 }
 0x251   :  { %857 = vmatpush1.bf16.msra.mxu0 %v2106_v51  ;;  %1625 = vmatpush3.bf16.msra.mxu1 %v2156_v59 }
 0x252   :  { %858 = vmatprep.subr.bf16.mxu0 %v2113_v53  ;;  %1626 = vmatprep.subr.bf16.mxu1 %v2677_v15 }
 0x255   :  { %859 = vmatpush1.bf16.msra.mxu0 %v2128_v55  ;;  %1627 = vmatpush3.bf16.msra.mxu1 %v2165_v61 }
 0x256   :  { %860 = vmatprep.subr.bf16.mxu0 %v2135_v56  ;;  %1628 = vmatprep.subr.bf16.mxu1 %v2677_v15 }
 0x259   :  { %861 = vmatpush1.bf16.msra.mxu0 %v2147_v58  ;;  %1629 = vmatpush3.bf16.msra.mxu1 %v2175_v62 }
 0x25a   :  { %951 = vmatprep.subr.bf16.mxu0 %v1996_v26  ;;  %1634 = vmatprep.subr.bf16.mxu1 %v2677_v15 }
 0x2fc   :  { %v775_v39 = vpop.f32.mrf.mxu0  ;;  %v816_v2 = vpop.f32.mrf.mxu1 }
 0x2fd   :  { %v776_v44 = vadd.f32 %v775_v39, %v2274_v63  ;;  %v817_v4 = vadd.f32 %v816_v2, %v2284_v1 }
 0x2fe   :  { %v777_v52 = vpop.f32.mrf.mxu0  ;;  %v1612_v19 = vpop.f32.mrf.mxu1 }
 0x2ff   :  { %v822_v6 = vadd.f32 %v776_v44, %v2228_v16  ;;  %v778_v35 = vadd.f32 %v777_v52, %v2279_v9 }
 0x300   :  { %v779_v10 = vpop.f32.mrf.mxu0  ;;  %v819_v20 = vpop.f32.mrf.mxu1 }
 0x301   :  { %v1428_v38 = vmul.f32 -1.442695, %v822_v6  ;;  %v829_v29 = vadd.f32 %v778_v35, %v2230_v18 }
 0x302   :  { %v780_v14 = vpop.f32.mrf.mxu0  ;;  %v1613_v24 = vpop.f32.mrf.mxu1 }
 0x303   :  { %1802 = vpow2.f32 %v1428_v38  ;;  %v1429_v48 = vmul.f32 -1.442695, %v829_v29 }
 0x305   :  { %1804 = vpow2.f32 %v1429_v48 }
 0x310   :  { %v1803_v11 = vpop.eup %1802 }
 0x311   :  { %v826_v0 = vadd.f32 1.0, %v1803_v11 }
 0x312   :  { %v1805_v31 = vpop.eup %1804 }
 0x313   :  { %1806 = vrcp.f32 %v826_v0  ;;  %v833_v3 = vadd.f32 1.0, %v1805_v31 }
 0x315   :  { %1808 = vrcp.f32 %v833_v3 }
 0x320   :  { %v1807_v16 = vpop.eup %1806 }
 0x321   :  { %v836_v7 = vmul.f32 %v1807_v16, %v817_v4 }
 0x322   :  { %v1809_v13 = vpop.eup %1808 }
 0x323   :  { %v837_v17 = vadd.f32 %v836_v7, %v2233_v21  ;;  %v839_v49 = vsub.f32 1.0, %v1809_v13  ;;  %v841_v18 = vmul.f32 %v1809_v13, %v2338_v5 }
 0x325   :  { %1810 = vtanh.f32 %v837_v17 }
 0x332   :  { %v1811_v39 = vpop.eup %1810 }
 0x333   :  { %v840_v44 = vmul.f32 %v1811_v39, %v839_v49 }
 0x335   :  { %v2388_v52 = vadd.f32 %v841_v18, %v840_v44 }
 0x337   :  { %1430 = vst [vmem:[%s2663_s5 + $0x10] sm:$0xff] %v2388_v52  ;;  %v845_v2 = vpack.c.bf16 %v2388_v52, %v2388_v52 }
 0x339   :  { %879 = vmatmul.mubr.bf16.vlgmr.msra.gmra.mxu0 %v845_v2  ;;  %1631 = vmatmul.mubr.bf16.vlgmr.msra.gmra.mxu1 %v845_v2 }
 0x33a   :  { %952 = vmatpush1.bf16.msra.mxu0 %v2001_v27  ;;  %1635 = vmatpush3.bf16.msra.mxu1 %v2055_v40 }
 0x33b   :  { %953 = vmatprep.subr.bf16.mxu0 %v2006_v28  ;;  %1636 = vmatprep.subr.bf16.mxu1 %v2677_v15 }
 0x33c   :  { %983 = vmatprep.mubr.bf16.mxu0 %v2678_v23  ;;  %1650 = vmatprep.mubr.msk.bf16.mxu1 %vm1888_vm0, %v2677_v15 }
 0x33e   :  { %954 = vmatpush1.bf16.msra.mxu0 %v2015_v30  ;;  %1637 = vmatpush3.bf16.msra.mxu1 %v2075_v45 }
 0x33f   :  { %955 = vmatprep.subr.bf16.mxu0 %v2032_v34  ;;  %1638 = vmatprep.subr.bf16.mxu1 %v2677_v15 }
 0x342   :  { %956 = vmatpush1.bf16.msra.mxu0 %v2038_v36  ;;  %1639 = vmatpush3.bf16.msra.mxu1 %v2100_v50 }
 0x343   :  { %957 = vmatprep.subr.bf16.mxu0 %v2044_v37  ;;  %1640 = vmatprep.subr.bf16.mxu1 %v2677_v15 }
 0x346   :  { %958 = vmatpush1.bf16.msra.mxu0 %v2061_v41  ;;  %1641 = vmatpush3.bf16.msra.mxu1 %v2120_v54 }
 0x347   :  { %959 = vmatprep.subr.bf16.mxu0 %v2068_v43  ;;  %1642 = vmatprep.subr.bf16.mxu1 %v2677_v15 }
 0x34a   :  { %960 = vmatpush1.bf16.msra.mxu0 %v2081_v46  ;;  %1643 = vmatpush3.bf16.msra.mxu1 %v2141_v57 }
 0x34b   :  { %961 = vmatprep.subr.bf16.mxu0 %v2088_v47  ;;  %1644 = vmatprep.subr.bf16.mxu1 %v2677_v15 }
 0x34e   :  { %962 = vmatpush1.bf16.msra.mxu0 %v2106_v51  ;;  %1645 = vmatpush3.bf16.msra.mxu1 %v2156_v59 }
 0x34f   :  { %963 = vmatprep.subr.bf16.mxu0 %v2113_v53  ;;  %1646 = vmatprep.subr.bf16.mxu1 %v2677_v15 }
 0x352   :  { %964 = vmatpush1.bf16.msra.mxu0 %v2128_v55  ;;  %1647 = vmatpush3.bf16.msra.mxu1 %v2165_v61 }
 0x353   :  { %965 = vmatprep.subr.bf16.mxu0 %v2135_v56  ;;  %1648 = vmatprep.subr.bf16.mxu1 %v2677_v15 }
 0x356   :  { %966 = vmatpush1.bf16.msra.mxu0 %v2147_v58  ;;  %1649 = vmatpush3.bf16.msra.mxu1 %v2175_v62 }
 0x357   :  { %1056 = vmatprep.subr.bf16.mxu0 %v1996_v26  ;;  %1654 = vmatprep.subr.bf16.mxu1 %v2677_v15 }
 0x3f9   :  { %v880_v21 = vpop.f32.mrf.mxu0  ;;  %v921_v5 = vpop.f32.mrf.mxu1 }
 0x3fa   :  { %v881_v19 = vadd.f32 %v880_v21, %v2274_v63  ;;  %v922_v7 = vadd.f32 %v921_v5, %v2284_v1 }
 0x3fb   :  { %v882_v6 = vpop.f32.mrf.mxu0  ;;  %v1632_v10 = vpop.f32.mrf.mxu1 }
 0x3fc   :  { %v927_v20 = vadd.f32 %v881_v19, %v2235_v22  ;;  %v883_v24 = vadd.f32 %v882_v6, %v2279_v9 }
 0x3fd   :  { %v884_v38 = vpop.f32.mrf.mxu0  ;;  %v924_v35 = vpop.f32.mrf.mxu1 }
 0x3fe   :  { %v1431_v14 = vmul.f32 -1.442695, %v927_v20  ;;  %v934_v11 = vadd.f32 %v883_v24, %v2237_v25 }
 0x3ff   :  { %v885_v29 = vpop.f32.mrf.mxu0  ;;  %v1633_v48 = vpop.f32.mrf.mxu1 }
 0x400   :  { %1812 = vpow2.f32 %v1431_v14  ;;  %v1432_v0 = vmul.f32 -1.442695, %v934_v11 }
 0x402   :  { %1814 = vpow2.f32 %v1432_v0 }
 0x40d   :  { %v1813_v31 = vpop.eup %1812 }
 0x40e   :  { %v931_v3 = vadd.f32 1.0, %v1813_v31 }
 0x40f   :  { %v1815_v4 = vpop.eup %1814 }
 0x410   :  { %1816 = vrcp.f32 %v931_v3  ;;  %v938_v16 = vadd.f32 1.0, %v1815_v4 }
 0x412   :  { %1818 = vrcp.f32 %v938_v16 }
 0x41d   :  { %v1817_v22 = vpop.eup %1816 }
 0x41e   :  { %v941_v17 = vmul.f32 %v1817_v22, %v922_v7 }
 0x41f   :  { %v1819_v49 = vpop.eup %1818 }
 0x420   :  { %v942_v13 = vadd.f32 %v941_v17, %v2240_v32  ;;  %v944_v39 = vsub.f32 1.0, %v1819_v49  ;;  %v946_v25 = vmul.f32 %v1819_v49, %v2388_v52  ;;  %v2516_v49 = vld [vmem:[%s2660_s2 + $0x90] ss:$12 sps:$4 sm:$0xff]  }
 0x422   :  { %1820 = vtanh.f32 %v942_v13  ;;  %v2506_v13 = vld [vmem:[%s2660_s2 + $0x94] ss:$12 sps:$4 sm:$0xff]  }
 0x42f   :  { %v1821_v44 = vpop.eup %1820 }
 0x430   :  { %v945_v18 = vmul.f32 %v1821_v44, %v944_v39 }
 0x432   :  { %v2438_v2 = vadd.f32 %v946_v25, %v945_v18  ;;  %v2679_v25 = vld [vmem:[#allocation6_spill] sm:$0xff] }
 0x434   :  { %1433 = vst [vmem:[%s2663_s5 + $0x18] sm:$0xff] %v2438_v2  ;;  %v950_v21 = vpack.c.bf16 %v2438_v2, %v2438_v2 }
 0x436   :  { %984 = vmatmul.mubr.bf16.vlgmr.msra.gmra.mxu0 %v950_v21  ;;  %1651 = vmatmul.mubr.bf16.vlgmr.msra.gmra.mxu1 %v950_v21 }
 0x437   :  { %1057 = vmatpush1.bf16.msra.mxu0 %v2001_v27  ;;  %1655 = vmatpush3.bf16.msra.mxu1 %v2055_v40 }
 0x438   :  { %1058 = vmatprep.subr.bf16.mxu0 %v2006_v28  ;;  %1656 = vmatprep.subr.bf16.mxu1 %v2677_v15 }
 0x439   :  { %1088 = vmatprep.mubr.bf16.mxu0 %v2678_v23  ;;  %1670 = vmatprep.mubr.msk.bf16.mxu1 %vm1888_vm0, %v2677_v15 }
 0x43b   :  { %1059 = vmatpush1.bf16.msra.mxu0 %v2015_v30  ;;  %1657 = vmatpush3.bf16.msra.mxu1 %v2075_v45 }
 0x43c   :  { %1060 = vmatprep.subr.bf16.mxu0 %v2032_v34  ;;  %1658 = vmatprep.subr.bf16.mxu1 %v2677_v15 }
 0x43f   :  { %1061 = vmatpush1.bf16.msra.mxu0 %v2038_v36  ;;  %1659 = vmatpush3.bf16.msra.mxu1 %v2100_v50 }
 0x440   :  { %1062 = vmatprep.subr.bf16.mxu0 %v2044_v37  ;;  %1660 = vmatprep.subr.bf16.mxu1 %v2677_v15 }
 0x443   :  { %1063 = vmatpush1.bf16.msra.mxu0 %v2061_v41  ;;  %1661 = vmatpush3.bf16.msra.mxu1 %v2120_v54 }
 0x444   :  { %1064 = vmatprep.subr.bf16.mxu0 %v2068_v43  ;;  %1662 = vmatprep.subr.bf16.mxu1 %v2677_v15 }
 0x447   :  { %1065 = vmatpush1.bf16.msra.mxu0 %v2081_v46  ;;  %1663 = vmatpush3.bf16.msra.mxu1 %v2141_v57 }
 0x448   :  { %1066 = vmatprep.subr.bf16.mxu0 %v2088_v47  ;;  %1664 = vmatprep.subr.bf16.mxu1 %v2677_v15 }
 0x44b   :  { %1067 = vmatpush1.bf16.msra.mxu0 %v2106_v51  ;;  %1665 = vmatpush3.bf16.msra.mxu1 %v2156_v59 }
 0x44c   :  { %1068 = vmatprep.subr.bf16.mxu0 %v2113_v53  ;;  %1666 = vmatprep.subr.bf16.mxu1 %v2677_v15 }
 0x44f   :  { %1069 = vmatpush1.bf16.msra.mxu0 %v2128_v55  ;;  %1667 = vmatpush3.bf16.msra.mxu1 %v2165_v61 }
 0x450   :  { %1070 = vmatprep.subr.bf16.mxu0 %v2135_v56  ;;  %1668 = vmatprep.subr.bf16.mxu1 %v2677_v15 }
 0x453   :  { %1071 = vmatpush1.bf16.msra.mxu0 %v2147_v58  ;;  %1669 = vmatpush3.bf16.msra.mxu1 %v2175_v62 }
 0x454   :  { %1161 = vmatprep.subr.bf16.mxu0 %v1996_v26  ;;  %1674 = vmatprep.subr.bf16.mxu1 %v2677_v15 }
 0x4f6   :  { %v985_v27 = vpop.f32.mrf.mxu0  ;;  %v1026_v28 = vpop.f32.mrf.mxu1 }
 0x4f7   :  { %v986_v30 = vadd.f32 %v985_v27, %v2274_v63  ;;  %v1027_v11 = vadd.f32 %v1026_v28, %v2284_v1 }
 0x4f8   :  { %v987_v34 = vpop.f32.mrf.mxu0  ;;  %v1652_v32 = vpop.f32.mrf.mxu1 }
 0x4f9   :  { %v1032_v52 = vadd.f32 %v986_v30, %v2242_v33  ;;  %v988_v10 = vadd.f32 %v987_v34, %v2279_v9 }
 0x4fa   :  { %v989_v5 = vpop.f32.mrf.mxu0  ;;  %v1029_v19 = vpop.f32.mrf.mxu1 }
 0x4fb   :  { %v1434_v6 = vmul.f32 -1.442695, %v1032_v52  ;;  %v1039_v26 = vadd.f32 %v988_v10, %v2247_v42  ;;  %v1867_v52 = vld [vmem:[%s2660_s2 + $0xb0] ss:$12 sps:$4 sm:$0xff]   ;;  %v1868_v5 = vld [vmem:[%s2660_s2 + $0x98] ss:$12 sps:$4 sm:$0xff]  }
 0x4fc   :  { %v990_v20 = vpop.f32.mrf.mxu0  ;;  %v1653_v38 = vpop.f32.mrf.mxu1  ;;  %v1869_v19 = vld [vmem:[%s2660_s2 + $0x78] ss:$12 sps:$4 sm:$0xff]   ;;  %v1872_v10 = vld [vmem:[%s2660_s2 + $0x60] ss:$12 sps:$4 sm:$0xff]  }
 0x4fd   :  { %1822 = vpow2.f32 %v1434_v6  ;;  %v1435_v35 = vmul.f32 -1.442695, %v1039_v26  ;;  %v1871_v6 = vld [vmem:[%s2660_s2 + $0x64] ss:$12 sps:$4 sm:$0xff]   ;;  %v1873_v20 = vld [vmem:[%s2660_s2 + $0x68] ss:$12 sps:$4 sm:$0xff]  }
 0x4fe   :  { %v1874_v38 = vld [vmem:[%s2660_s2 + $0x4c] ss:$12 sps:$4 sm:$0xff]   ;;  %v1875_v26 = vld [vmem:[%s2660_s2 + $0x48] ss:$12 sps:$4 sm:$0xff]  }
 0x4ff   :  { %1824 = vpow2.f32 %v1435_v35  ;;  %v1876_v35 = vld [vmem:[%s2660_s2 + $0x50] ss:$12 sps:$4 sm:$0xff]  }
 0x50a   :  { %v1823_v14 = vpop.eup %1822 }
 0x50b   :  { %v1036_v24 = vadd.f32 1.0, %v1823_v14  ;;  %v1877_v14 = vld [vmem:[%s2660_s2 + $0x34] ss:$12 sps:$4 sm:$0xff]  }
 0x50c   :  { %v1825_v29 = vpop.eup %1824 }
 0x50d   :  { %1826 = vrcp.f32 %v1036_v24  ;;  %v1043_v48 = vadd.f32 1.0, %v1825_v29  ;;  %v1878_v24 = vld [vmem:[%s2660_s2 + $0x30] ss:$12 sps:$4 sm:$0xff]   ;;  %v1879_v29 = vld [vmem:[%s2660_s2 + $0x38] ss:$12 sps:$4 sm:$0xff]  }
 0x50f   :  { %1828 = vrcp.f32 %v1043_v48  ;;  %v1880_v48 = vld [vmem:[%s2660_s2 + $0x1c] ss:$12 sps:$4 sm:$0xff]  }
 0x51a   :  { %v1827_v33 = vpop.eup %1826 }
 0x51b   :  { %v1046_v0 = vmul.f32 %v1827_v33, %v1027_v11  ;;  %v1881_v11 = vld [vmem:[%s2660_s2 + $0x18] ss:$12 sps:$4 sm:$0xff]   ;;  %v1882_v33 = vld [vmem:[%s2660_s2 + $0x20] ss:$12 sps:$4 sm:$0xff]  }
 0x51c   :  { %v1829_v3 = vpop.eup %1828 }
 0x51d   :  { %v1047_v31 = vadd.f32 %v1046_v0, %v2255_v8  ;;  %v1049_v4 = vsub.f32 1.0, %v1829_v3  ;;  %v1051_v42 = vmul.f32 %v1829_v3, %v2438_v2  ;;  %v2499_v8 = vld [vmem:[%s2660_s2 + $0xa8] ss:$12 sps:$4 sm:$0xff]   ;;  %v1883_v0 = vld [vmem:[%s2660_s2 + $0x4] ss:$12 sps:$4 sm:$0xff]  }
 0x51e   :  { %v1885_v3 = vld [vmem:[%s2660_s2 + $0x8] ss:$12 sps:$4 sm:$0xff]  }
 0x51f   :  { %1830 = vtanh.f32 %v1047_v31  ;;  %v1884_v31 = vld [vmem:[%s2660_s2] ss:$12 sps:$4 sm:$0xff]  }
 0x52c   :  { %v1831_v16 = vpop.eup %1830 }
 0x52d   :  { %v1050_v7 = vmul.f32 %v1831_v16, %v1049_v4 }
 0x52f   :  { %v2488_v22 = vadd.f32 %v1051_v42, %v1050_v7 }
 0x531   :  { %1436 = vst [vmem:[%s2663_s5 + $0x20] sm:$0xff] %v2488_v22  ;;  %v1055_v17 = vpack.c.bf16 %v2488_v22, %v2488_v22 }
 0x533   :  { %1089 = vmatmul.mubr.bf16.vlgmr.msra.gmra.mxu0 %v1055_v17  ;;  %1671 = vmatmul.mubr.bf16.vlgmr.msra.gmra.mxu1 %v1055_v17  ;;  %v2680_v17 = vld [vmem:[#allocation5_spill] sm:$0xff] }
 0x534   :  { %1162 = vmatpush1.bf16.msra.mxu0 %v2499_v8  ;;  %1675 = vmatpush3.bf16.msra.mxu1 %v2055_v40  ;;  %v2523_v40 = vld [vmem:[%s2660_s2 + $0x7c] ss:$12 sps:$4 sm:$0xff]  }
 0x535   :  { %1163 = vmatprep.subr.bf16.mxu0 %v2506_v13  ;;  %1676 = vmatprep.subr.bf16.mxu1 %v2677_v15 }
 0x536   :  { %1193 = vmatprep.mubr.bf16.mxu0 %v2678_v23  ;;  %1690 = vmatprep.mubr.msk.bf16.mxu1 %vm1888_vm0, %v2677_v15 }
 0x538   :  { %1164 = vmatpush1.bf16.msra.mxu0 %v2516_v49  ;;  %1677 = vmatpush3.bf16.msra.mxu1 %v2075_v45 }
 0x539   :  { %1165 = vmatprep.subr.bf16.mxu0 %v2523_v40  ;;  %1678 = vmatprep.subr.bf16.mxu1 %v2677_v15 }
 0x53c   :  { %1166 = vmatpush1.bf16.msra.mxu0 %v2038_v36  ;;  %1679 = vmatpush3.bf16.msra.mxu1 %v2100_v50  ;;  %v1866_v36 = vld [vmem:[%s2660_s2 + $0xac] ss:$12 sps:$4 sm:$0xff]  }
 0x53d   :  { %1167 = vmatprep.subr.bf16.mxu0 %v2044_v37  ;;  %1680 = vmatprep.subr.bf16.mxu1 %v2677_v15 }
 0x540   :  { %1168 = vmatpush1.bf16.msra.mxu0 %v2061_v41  ;;  %1681 = vmatpush3.bf16.msra.mxu1 %v2120_v54 }
 0x541   :  { %1169 = vmatprep.subr.bf16.mxu0 %v2068_v43  ;;  %1682 = vmatprep.subr.bf16.mxu1 %v2677_v15 }
 0x544   :  { %1170 = vmatpush1.bf16.msra.mxu0 %v2081_v46  ;;  %1683 = vmatpush3.bf16.msra.mxu1 %v2141_v57 }
 0x545   :  { %1171 = vmatprep.subr.bf16.mxu0 %v2088_v47  ;;  %1684 = vmatprep.subr.bf16.mxu1 %v2677_v15 }
 0x548   :  { %1172 = vmatpush1.bf16.msra.mxu0 %v2106_v51  ;;  %1685 = vmatpush3.bf16.msra.mxu1 %v2156_v59 }
 0x549   :  { %1173 = vmatprep.subr.bf16.mxu0 %v2113_v53  ;;  %1686 = vmatprep.subr.bf16.mxu1 %v2677_v15 }
 0x54c   :  { %1174 = vmatpush1.bf16.msra.mxu0 %v2128_v55  ;;  %1687 = vmatpush3.bf16.msra.mxu1 %v2165_v61 }
 0x54d   :  { %1175 = vmatprep.subr.bf16.mxu0 %v2135_v56  ;;  %1688 = vmatprep.subr.bf16.mxu1 %v2677_v15 }
 0x550   :  { %1176 = vmatpush1.bf16.msra.mxu0 %v2147_v58  ;;  %1689 = vmatpush3.bf16.msra.mxu1 %v2175_v62 }
 0x551   :  { %1266 = vmatprep.subr.bf16.mxu0 %v1866_v36  ;;  %1694 = vmatprep.subr.bf16.mxu1 %v2677_v15 }
 0x5f3   :  { %v1090_v37 = vpop.f32.mrf.mxu0  ;;  %v1131_v41 = vpop.f32.mrf.mxu1 }
 0x5f4   :  { %v1091_v43 = vadd.f32 %v1090_v37, %v2274_v63  ;;  %v1132_v44 = vadd.f32 %v1131_v41, %v2284_v1  ;;  %v2681_v41 = vld [vmem:[#allocation7_spill] sm:$0xff] }
 0x5f5   :  { %v1092_v45 = vpop.f32.mrf.mxu0  ;;  %v1672_v46 = vpop.f32.mrf.mxu1 }
 0x5f6   :  { %v1137_v47 = vadd.f32 %v1091_v43, %v2252_v60  ;;  %v1093_v54 = vadd.f32 %v1092_v45, %v2279_v9 }
 0x5f7   :  { %v1094_v50 = vpop.f32.mrf.mxu0  ;;  %v1134_v51 = vpop.f32.mrf.mxu1 }
 0x5f8   :  { %v1437_v53 = vmul.f32 -1.442695, %v1137_v47  ;;  %v1144_v57 = vadd.f32 %v1093_v54, %v2257_v12 }
 0x5f9   :  { %v1095_v55 = vpop.f32.mrf.mxu0  ;;  %v1673_v56 = vpop.f32.mrf.mxu1 }
 0x5fa   :  { %1832 = vpow2.f32 %v1437_v53  ;;  %v1438_v58 = vmul.f32 -1.442695, %v1144_v57  ;;  %v2682_v56 = vld [vmem:[#allocation3_spill] sm:$0xff] }
 0x5fc   :  { %1834 = vpow2.f32 %v1438_v58 }
 0x607   :  { %v1833_v59 = vpop.eup %1832 }
 0x608   :  { %v1141_v61 = vadd.f32 1.0, %v1833_v59 }
 0x609   :  { %v1835_v62 = vpop.eup %1834 }
 0x60a   :  { %1836 = vrcp.f32 %v1141_v61  ;;  %v1148_v39 = vadd.f32 1.0, %v1835_v62 }
 0x60c   :  { %1838 = vrcp.f32 %v1148_v39 }
 0x617   :  { %v1837_v60 = vpop.eup %1836 }
 0x618   :  { %v1151_v18 = vmul.f32 %v1837_v60, %v1132_v44 }
 0x619   :  { %v1839_v21 = vpop.eup %1838 }
 0x61a   :  { %v1152_v2 = vadd.f32 %v1151_v18, %v2679_v25  ;;  %v1154_v27 = vsub.f32 1.0, %v1839_v21  ;;  %v1156_v12 = vmul.f32 %v1839_v21, %v2488_v22 }
 0x61c   :  { %1840 = vtanh.f32 %v1152_v2 }
 0x629   :  { %v1841_v28 = vpop.eup %1840 }
 0x62a   :  { %v1155_v30 = vmul.f32 %v1841_v28, %v1154_v27  ;;  %v2683_v28 = vld [vmem:[#allocation8_spill] sm:$0xff] }
 0x62c   :  { %v2560_v34 = vadd.f32 %v1156_v12, %v1155_v30 }
 0x62e   :  { %1439 = vst [vmem:[%s2663_s5 + $0x28] sm:$0xff] %v2560_v34  ;;  %v1160_v32 = vpack.c.bf16 %v2560_v34, %v2560_v34 }
 0x630   :  { %1194 = vmatmul.mubr.bf16.vlgmr.msra.gmra.mxu0 %v1160_v32  ;;  %1691 = vmatmul.mubr.bf16.vlgmr.msra.gmra.mxu1 %v1160_v32 }
 0x631   :  { %1267 = vmatpush1.bf16.msra.mxu0 %v2499_v8  ;;  %1695 = vmatpush3.bf16.msra.mxu1 %v1867_v52 }
 0x632   :  { %1268 = vmatprep.subr.bf16.mxu0 %v2506_v13  ;;  %1696 = vmatprep.subr.bf16.mxu1 %v2677_v15 }
 0x633   :  { %1298 = vmatprep.mubr.bf16.mxu0 %v2678_v23  ;;  %1710 = vmatprep.mubr.msk.bf16.mxu1 %vm1888_vm0, %v2677_v15  ;;  %v1870_v23 = vld [vmem:[%s2660_s2 + $0x80] ss:$12 sps:$4 sm:$0xff]  }
 0x635   :  { %1269 = vmatpush1.bf16.msra.mxu0 %v2516_v49  ;;  %1697 = vmatpush3.bf16.msra.mxu1 %v1868_v5 }
 0x636   :  { %1270 = vmatprep.subr.bf16.mxu0 %v2523_v40  ;;  %1698 = vmatprep.subr.bf16.mxu1 %v2677_v15 }
 0x639   :  { %1271 = vmatpush1.bf16.msra.mxu0 %v1869_v19  ;;  %1699 = vmatpush3.bf16.msra.mxu1 %v1870_v23  ;;  %v2684_v23 = vld [vmem:[#allocation9_spill] sm:$0xff] }
 0x63a   :  { %1272 = vmatprep.subr.bf16.mxu0 %v1871_v6  ;;  %1700 = vmatprep.subr.bf16.mxu1 %v2677_v15 }
 0x63d   :  { %1273 = vmatpush1.bf16.msra.mxu0 %v1872_v10  ;;  %1701 = vmatpush3.bf16.msra.mxu1 %v1873_v20 }
 0x63e   :  { %1274 = vmatprep.subr.bf16.mxu0 %v1874_v38  ;;  %1702 = vmatprep.subr.bf16.mxu1 %v2677_v15 }
 0x641   :  { %1275 = vmatpush1.bf16.msra.mxu0 %v1875_v26  ;;  %1703 = vmatpush3.bf16.msra.mxu1 %v1876_v35 }
 0x642   :  { %1276 = vmatprep.subr.bf16.mxu0 %v1877_v14  ;;  %1704 = vmatprep.subr.bf16.mxu1 %v2677_v15 }
 0x645   :  { %1277 = vmatpush1.bf16.msra.mxu0 %v1878_v24  ;;  %1705 = vmatpush3.bf16.msra.mxu1 %v1879_v29  ;;  %v2685_v29 = vld [vmem:[#allocation4_spill] sm:$0xff] }
 0x646   :  { %1278 = vmatprep.subr.bf16.mxu0 %v1880_v48  ;;  %1706 = vmatprep.subr.bf16.mxu1 %v2677_v15 }
 0x649   :  { %1279 = vmatpush1.bf16.msra.mxu0 %v1881_v11  ;;  %1707 = vmatpush3.bf16.msra.mxu1 %v1882_v33 }
 0x64a   :  { %1280 = vmatprep.subr.bf16.mxu0 %v1883_v0  ;;  %1708 = vmatprep.subr.bf16.mxu1 %v2677_v15 }
 0x64d   :  { %1281 = vmatpush1.bf16.msra.mxu0 %v1884_v31  ;;  %1709 = vmatpush3.bf16.msra.mxu1 %v1885_v3 }
 0x6f0   :  { %v1195_v4 = vpop.f32.mrf.mxu0  ;;  %v1236_v16 = vpop.f32.mrf.mxu1 }
 0x6f1   :  { %v1196_v7 = vadd.f32 %v1195_v4, %v2274_v63  ;;  %v1237_v53 = vadd.f32 %v1236_v16, %v2284_v1 }
 0x6f2   :  { %v1197_v42 = vpop.f32.mrf.mxu0  ;;  %v1692_v22 = vpop.f32.mrf.mxu1 }
 0x6f3   :  { %v1242_v8 = vadd.f32 %v1196_v7, %v2680_v17  ;;  %v1198_v40 = vadd.f32 %v1197_v42, %v2279_v9 }
 0x6f4   :  { %v1199_v13 = vpop.f32.mrf.mxu0  ;;  %v1239_v15 = vpop.f32.mrf.mxu1 }
 0x6f5   :  { %v1440_v49 = vmul.f32 -1.442695, %v1242_v8  ;;  %v1249_v43 = vadd.f32 %v1198_v40, %v2681_v41 }
 0x6f6   :  { %v1200_v36 = vpop.f32.mrf.mxu0  ;;  %v1693_v37 = vpop.f32.mrf.mxu1 }
 0x6f7   :  { %1842 = vpow2.f32 %v1440_v49  ;;  %v1441_v45 = vmul.f32 -1.442695, %v1249_v43 }
 0x6f9   :  { %1844 = vpow2.f32 %v1441_v45 }
 0x704   :  { %v1843_v46 = vpop.eup %1842 }
 0x705   :  { %v1246_v47 = vadd.f32 1.0, %v1843_v46 }
 0x706   :  { %v1845_v50 = vpop.eup %1844 }
 0x707   :  { %1846 = vrcp.f32 %v1246_v47  ;;  %v1253_v51 = vadd.f32 1.0, %v1845_v50 }
 0x709   :  { %1848 = vrcp.f32 %v1253_v51 }
 0x714   :  { %v1847_v54 = vpop.eup %1846 }
 0x715   :  { %v1256_v55 = vmul.f32 %v1847_v54, %v1237_v53 }
 0x716   :  { %v1849_v58 = vpop.eup %1848 }
 0x717   :  { %v1257_v57 = vadd.f32 %v1256_v55, %v2682_v56  ;;  %v1259_v59 = vsub.f32 1.0, %v1849_v58  ;;  %v1261_v39 = vmul.f32 %v1849_v58, %v2560_v34 }
 0x719   :  { %1850 = vtanh.f32 %v1257_v57 }
 0x726   :  { %v1851_v61 = vpop.eup %1850 }
 0x727   :  { %v1260_v62 = vmul.f32 %v1851_v61, %v1259_v59 }
 0x729   :  { %v1262_v44 = vadd.f32 %v1261_v39, %v1260_v62 }
 0x72b   :  { %1442 = vst [vmem:[%s2663_s5 + $0x30] sm:$0xff] %v1262_v44  ;;  %v1265_v60 = vpack.c.bf16 %v1262_v44, %v1262_v44 }
 0x72d   :  { %1299 = vmatmul.mubr.bf16.vlgmr.msra.gmra.mxu0 %v1265_v60  ;;  %1711 = vmatmul.mubr.bf16.vlgmr.msra.gmra.mxu1 %v1265_v60 }
 0x7ed   :  { %v1300_v18 = vpop.f32.mrf.mxu0  ;;  %v1341_v25 = vpop.f32.mrf.mxu1 }
 0x7ee   :  { %v1301_v2 = vadd.f32 %v1300_v18, %v2274_v63  ;;  %v1342_v35 = vadd.f32 %v1341_v25, %v2284_v1 }
 0x7ef   :  { %v1302_v21 = vpop.f32.mrf.mxu0  ;;  %v1712_v27 = vpop.f32.mrf.mxu1 }
 0x7f0   :  { %v1347_v30 = vadd.f32 %v1301_v2, %v2683_v28  ;;  %v1303_v34 = vadd.f32 %v1302_v21, %v2279_v9 }
 0x7f1   :  { %v1304_v12 = vpop.f32.mrf.mxu0  ;;  %v1344_v32 = vpop.f32.mrf.mxu1 }
 0x7f2   :  { %v1443_v52 = vmul.f32 -1.442695, %v1347_v30  ;;  %v1354_v6 = vadd.f32 %v1303_v34, %v2684_v23 }
 0x7f3   :  { %v1305_v5 = vpop.f32.mrf.mxu0  ;;  %v1713_v19 = vpop.f32.mrf.mxu1 }
 0x7f4   :  { %1852 = vpow2.f32 %v1443_v52  ;;  %v1444_v10 = vmul.f32 -1.442695, %v1354_v6 }
 0x7f6   :  { %1854 = vpow2.f32 %v1444_v10 }
 0x801   :  { %v1853_v20 = vpop.eup %1852 }
 0x802   :  { %v1351_v38 = vadd.f32 1.0, %v1853_v20 }
 0x803   :  { %v1855_v63 = vpop.eup %1854 }
 0x804   :  { %1856 = vrcp.f32 %v1351_v38  ;;  %v1358_v26 = vadd.f32 1.0, %v1855_v63 }
 0x806   :  { %1858 = vrcp.f32 %v1358_v26 }
 0x811   :  { %v1857_v14 = vpop.eup %1856 }
 0x812   :  { %v1361_v24 = vmul.f32 %v1857_v14, %v1342_v35 }
 0x813   :  { %v1859_v9 = vpop.eup %1858 }
 0x814   :  { %v1362_v48 = vadd.f32 %v1361_v24, %v2685_v29  ;;  %v1364_v11 = vsub.f32 1.0, %v1859_v9  ;;  %v1366_v31 = vmul.f32 %v1859_v9, %v1262_v44 }
 0x816   :  { %1860 = vtanh.f32 %v1362_v48 }
 0x823   :  { %v1861_v33 = vpop.eup %1860 }
 0x824   :  { %v1365_v0 = vmul.f32 %v1861_v33, %v1364_v11 }
 0x826   :  { %v1367_v3 = vadd.f32 %v1366_v31, %v1365_v0 }
 0x828   :  { %1445 = vst [vmem:[%s2663_s5 + $0x38] sm:$0xff] %v1367_v3 }

</bundles_post_ra>
